<compile_context>
chip_gen: v6e
topology: v6e:2x2x1
jax: 0.10.0
libtpu: 0.0.40
codegen_flags: <defaults>
</compile_context>

<pallas_src>
import math
from functools import partial

import jax
import jax.numpy as jnp
from jax.experimental import pallas as pl
from jax.experimental.pallas import tpu as pltpu


def _round_up(x, m):
    return ((x + m - 1) // m) * m


def _cifm_kernel(ac_ref, acc_full_ref, acc_tile_ref, mask_ref,
                 w_kv1_ref, b_kv1_ref,        # acoustic -> [K1 | V1]   (Dp, 2Cp), (1, 2Cp)
                 w_q1_ref, b_q1_ref,          # accent_to_q             (Cp, Cp),  (1, Cp)
                 w_kv2_ref, b_kv2_ref,        # accent -> [K2 | V2]     (Cp, 2Cp), (1, 2Cp)
                 w_q2_ref, b_q2_ref,          # intermediate_q          (Cp, Cp),  (1, Cp)
                 gamma_ref, beta_ref,         # LayerNorm               (1, Cp),   (1, Cp)
                 out_ref,
                 k1_scr, v1_scr, k2_scr, v2_scr,
                 *, norm_eps, c_real):
    f32, bf16 = jnp.float32, jnp.bfloat16
    Cp = out_ref.shape[-1]
    scale = c_real ** -0.5
    dn = (((1,), (1,)), ((), ()))   # contract last dims: Q @ K^T without an XLU transpose

    # ---- per-batch K/V caches: projected once (first q-tile), reused by every later tile ----
    @pl.when(pl.program_id(1) == 0)
    def _():
        kv1 = jnp.dot(ac_ref[0], w_kv1_ref[...], preferred_element_type=f32) + b_kv1_ref[...]
        k1_scr[...] = kv1[:, :Cp].astype(bf16)     # Cp is a multiple of 128 -> lane-aligned slice
        v1_scr[...] = kv1[:, Cp:].astype(bf16)
        kv2 = jnp.dot(acc_full_ref[0], w_kv2_ref[...], preferred_element_type=f32) + b_kv2_ref[...]
        k2_scr[...] = kv2[:, :Cp].astype(bf16)
        v2_scr[...] = kv2[:, Cp:].astype(bf16)

    # Additive key-mask bias (finite -> no NaN even if a whole row is masked).
    bias = jnp.where(mask_ref[0] > 0.0, 0.0, -1e30).astype(f32)            # (1, Tp)

    # Tile-local Q1; 1/sqrt(C) folded into the query (saves a (Tq,Tp) VPU multiply).
    q1 = ((jnp.dot(acc_tile_ref[0], w_q1_ref[...], preferred_element_type=f32)
           + b_q1_ref[...]) * scale).astype(bf16)                          # (Tq, Cp)

    # ---- attention 1: accent queries attend over acoustic K/V ----
    s1 = jax.lax.dot_general(q1, k1_scr[...], dn, preferred_element_type=f32) + bias   # (Tq, Tp)
    p1 = jnp.exp(s1 - jnp.max(s1, axis=-1, keepdims=True))
    l1 = jnp.sum(p1, axis=-1, keepdims=True)
    o1 = jnp.dot(p1.astype(bf16), v1_scr[...], preferred_element_type=f32)              # (Tq, Cp)
    # softmax denom applied after P@V; relu commutes with multiplication by 1/l > 0.
    o1 = jnp.maximum(o1 * pl.reciprocal(l1, approx=True), 0.0)

    # ---- attention 2: intermediate queries attend over accent K/V ----
    q2 = ((jnp.dot(o1.astype(bf16), w_q2_ref[...], preferred_element_type=f32)
           + b_q2_ref[...]) * scale).astype(bf16)
    s2 = jax.lax.dot_general(q2, k2_scr[...], dn, preferred_element_type=f32) + bias    # (Tq, Tp)
    p2 = jnp.exp(s2 - jnp.max(s2, axis=-1, keepdims=True))
    l2 = jnp.sum(p2, axis=-1, keepdims=True)
    o2 = jnp.dot(p2.astype(bf16), v2_scr[...], preferred_element_type=f32)              # (Tq, Cp)
    o2 = jnp.maximum(o2 * pl.reciprocal(l2, approx=True), 0.0)

    # ---- LayerNorm over the real feature dim (padded feature columns are exactly 0) ----
    inv_c = 1.0 / c_real
    mu = jnp.sum(o2, axis=-1, keepdims=True) * inv_c
    d = o2 - mu
    if Cp != c_real:
        col_mask = jax.lax.broadcasted_iota(jnp.int32, (1, Cp), 1) < c_real
        var = jnp.sum(jnp.where(col_mask, d * d, 0.0), axis=-1, keepdims=True) * inv_c
    else:
        var = jnp.sum(d * d, axis=-1, keepdims=True) * inv_c
    y = d * jax.lax.rsqrt(var + norm_eps)
    out_ref[0] = (y * gamma_ref[...] + beta_ref[...]).astype(out_ref.dtype)


def cross_info_fusion(acoustic, accent, mask, params, *, norm_eps=1e-5, q_tile=256):
    """acoustic: (B,T,D)  accent: (B,T,C)  mask: (B,1,T) float (1 = keep key) -> (B,T,C) f32."""
    B, T, D = acoustic.shape
    C = accent.shape[-1]
    bf16, f32 = jnp.bfloat16, jnp.float32

    (wk1, bk1, wv1, bv1, wq1, bq1, wq2, bq2, wk2, bk2, wv2, bv2, gamma, beta) = params

    # Lane-align feature dims (128 lanes) and pick a sublane-aligned query tile.
    # q_tile=256 suits v6e's 2x256^2 MXU; 128 is already enough on v5e.
    Dp = _round_up(D, 128)
    Cp = _round_up(C, 128)
    tq = q_tile if T >= q_tile else _round_up(T, 8)
    Tp = _round_up(T, tq)
    nq = Tp // tq

    def pad2(w, r, c):
        return jnp.pad(w, ((0, r - w.shape[0]), (0, c - w.shape[1])))

    # Activations (bf16 MXU operands); padded key positions are masked out via the padded mask.
    ac_p = jnp.pad(acoustic, ((0, 0), (0, Tp - T), (0, Dp - D))).astype(bf16)
    acc_p = jnp.pad(accent, ((0, 0), (0, Tp - T), (0, Cp - C))).astype(bf16)
    mask_p = jnp.pad(mask.astype(f32), ((0, 0), (0, 0), (0, Tp - T)))

    # Fused projection weights; every logical segment starts on a 128-lane boundary.
    w_kv1 = jnp.concatenate([pad2(wk1, Dp, Cp), pad2(wv1, Dp, Cp)], axis=1).astype(bf16)
    b_kv1 = jnp.concatenate([pad2(bk1, 1, Cp), pad2(bv1, 1, Cp)], axis=1).astype(f32)
    w_kv2 = jnp.concatenate([pad2(wk2, Cp, Cp), pad2(wv2, Cp, Cp)], axis=1).astype(bf16)
    b_kv2 = jnp.concatenate([pad2(bk2, 1, Cp), pad2(bv2, 1, Cp)], axis=1).astype(f32)
    w_q1 = pad2(wq1, Cp, Cp).astype(bf16)
    b_q1 = pad2(bq1, 1, Cp).astype(f32)
    w_q2 = pad2(wq2, Cp, Cp).astype(bf16)
    b_q2 = pad2(bq2, 1, Cp).astype(f32)
    gamma_p = pad2(gamma, 1, Cp).astype(f32)
    beta_p = pad2(beta, 1, Cp).astype(f32)

    def full_seq(d):
        return pl.BlockSpec((1, Tp, d), lambda b, i: (b, 0, 0))

    def const(shape):
        return pl.BlockSpec(shape, lambda b, i: (0,) * len(shape))

    in_specs = [
        full_seq(Dp),                                       # acoustic: K1/V1 source (used at i==0)
        full_seq(Cp),                                       # accent (full seq): K2/V2 source (i==0)
        pl.BlockSpec((1, tq, Cp), lambda b, i: (b, i, 0)),  # accent (tile): Q1 source
        pl.BlockSpec((1, 1, Tp), lambda b, i: (b, 0, 0)),   # key mask
        const((Dp, 2 * Cp)), const((1, 2 * Cp)),            # acoustic_to_{k,v}
        const((Cp, Cp)), const((1, Cp)),                    # accent_to_q
        const((Cp, 2 * Cp)), const((1, 2 * Cp)),            # accent_to_{k2,v2}
        const((Cp, Cp)), const((1, Cp)),                    # intermediate_q
        const((1, Cp)), const((1, Cp)),                     # LayerNorm gamma / beta
    ]

    # VMEM budget: K/V caches + double-buffered activation inputs + output block + weights +
    # live (Tq,Tp) score tiles + i==0 projection intermediates, plus headroom; clamped to 75%
    # of physical VMEM (64 MiB per TC on v7x, 128 MiB on v5e/v6e).
    est = (4 * Tp * Cp * 2                                   # bf16 K/V caches
           + 2 * (Tp * Dp + Tp * Cp + tq * Cp) * 2           # double-buffered bf16 inputs
           + 2 * tq * Cp * 4 + 2 * Tp * 4                    # output block + mask
           + 2 * (2 * Dp * Cp + 4 * Cp * Cp + 8 * Cp) * 2    # weights (double-buffered)
           + 2 * tq * Tp * 4                                 # f32 score tiles
           + 4 * Tp * Cp * 4                                 # f32 projection intermediates (i==0)
           + (8 << 20))                                      # headroom
    try:
        phys = pltpu.get_tpu_info().vmem_capacity_bytes
    except Exception:
        phys = 64 * 1024 * 1024
    vmem_limit = int(min(max(est, 32 << 20), int(phys * 0.75)))

    out = pl.pallas_call(
        partial(_cifm_kernel, norm_eps=norm_eps, c_real=C),
        out_shape=jax.ShapeDtypeStruct((B, Tp, Cp), jnp.float32),
        grid_spec=pltpu.PrefetchScalarGridSpec(
            num_scalar_prefetch=0,
            grid=(B, nq),
            in_specs=in_specs,
            out_specs=pl.BlockSpec((1, tq, Cp), lambda b, i: (b, i, 0)),
            scratch_shapes=[pltpu.VMEM((Tp, Cp), bf16)] * 4,   # K1, V1, K2, V2 caches
        ),
        compiler_params=pltpu.CompilerParams(
            # B "parallel" (megacore / 2-TC sharding); q-tile axis "arbitrary" so the per-batch
            # K/V scratch caches stay valid across tiles.
            dimension_semantics=("parallel", "arbitrary"),
            vmem_limit_bytes=vmem_limit,
        ),
    )(ac_p, acc_p, acc_p, mask_p,
      w_kv1, b_kv1, w_q1, b_q1, w_kv2, b_kv2, w_q2, b_q2, gamma_p, beta_p)

    return out[:, :T, :C]


def _reference(acoustic, accent, mask, params, norm_eps=1e-5):
    """Plain-JAX f32 reference mirroring the PyTorch forward."""
    (wk1, bk1, wv1, bv1, wq1, bq1, wq2, bq2, wk2, bk2, wv2, bv2, gamma, beta) = params
    C = accent.shape[-1]
    scale = 1.0 / math.sqrt(C)

    K1 = acoustic @ wk1 + bk1
    V1 = acoustic @ wv1 + bv1
    Q1 = accent @ wq1 + bq1
    s1 = jnp.einsum("btc,bsc->bts", Q1, K1) * scale
    s1 = jnp.where(mask > 0.0, s1, -jnp.inf)
    o1 = jax.nn.relu(jnp.einsum("bts,bsc->btc", jax.nn.softmax(s1, axis=-1), V1))

    Q2 = o1 @ wq2 + bq2
    K2 = accent @ wk2 + bk2
    V2 = accent @ wv2 + bv2
    s2 = jnp.einsum("btc,bsc->bts", Q2, K2) * scale
    s2 = jnp.where(mask > 0.0, s2, -jnp.inf)
    o2 = jax.nn.relu(jnp.einsum("bts,bsc->btc", jax.nn.softmax(s2, axis=-1), V2))

    mu = jnp.mean(o2, axis=-1, keepdims=True)
    var = jnp.mean((o2 - mu) ** 2, axis=-1, keepdims=True)
    return (o2 - mu) * jax.lax.rsqrt(var + norm_eps) * gamma + beta


if __name__ == "__main__":
    B, T = 2, 16
    acoustic_dim, accent_dim = 32, 32  # D, C

    key = jax.random.PRNGKey(0)
    keys = jax.random.split(key, 16)

    acoustic = jax.random.normal(keys[0], (B, T, acoustic_dim), jnp.float32)
    accent = jax.random.normal(keys[1], (B, T, accent_dim), jnp.float32)
    # mask: (B, 1, T) — keep the first 11 key positions of batch 0, all of batch 1
    lengths = jnp.array([11, T], jnp.int32)
    mask = (jnp.arange(T)[None, None, :] < lengths[:, None, None]).astype(jnp.float32)

    def lin(kw, kb, d_in, d_out):
        w = 0.1 * jax.random.normal(kw, (d_in, d_out), jnp.float32)   # already (in, out)
        b = 0.1 * jax.random.normal(kb, (1, d_out), jnp.float32)
        return w, b

    wk1, bk1 = lin(keys[2], keys[3], acoustic_dim, accent_dim)
    wv1, bv1 = lin(keys[4], keys[5], acoustic_dim, accent_dim)
    wq1, bq1 = lin(keys[6], keys[7], accent_dim, accent_dim)
    wq2, bq2 = lin(keys[8], keys[9], accent_dim, accent_dim)
    wk2, bk2 = lin(keys[10], keys[11], accent_dim, accent_dim)
    wv2, bv2 = lin(keys[12], keys[13], accent_dim, accent_dim)
    gamma = jnp.ones((1, accent_dim), jnp.float32)
    beta = jnp.zeros((1, accent_dim), jnp.float32)

    params = (wk1, bk1, wv1, bv1, wq1, bq1, wq2, bq2, wk2, bk2, wv2, bv2, gamma, beta)

    out = jax.block_until_ready(cross_info_fusion(acoustic, accent, mask, params))
    ref = jax.block_until_ready(_reference(acoustic, accent, mask, params))

    assert out.shape == (B, T, accent_dim)
    # Matmul operands are bf16 on the MXU and the softmax reciprocal uses the EUP approx path
    # (accumulation / softmax stats / LayerNorm stats stay f32) -> tolerance looser than pure f32.
    assert jnp.allclose(out, ref, atol=5e-2, rtol=5e-2), "mismatch vs reference"

    print("KERNEL_OK")
</pallas_src>

<mosaic_0001>
module attributes {stable_mosaic.version = 11 : i64} {
  func.func @_cifm_kernel(%arg0: i32, %arg1: i32, %arg2: memref<1x16x128xbf16, #tpu.memory_space<vmem>>, %arg3: memref<1x16x128xbf16, #tpu.memory_space<vmem>>, %arg4: memref<1x16x128xbf16, #tpu.memory_space<vmem>>, %arg5: memref<1x1x16xf32, #tpu.memory_space<vmem>>, %arg6: memref<128x256xbf16, #tpu.memory_space<vmem>>, %arg7: memref<1x256xf32, #tpu.memory_space<vmem>>, %arg8: memref<128x128xbf16, #tpu.memory_space<vmem>>, %arg9: memref<1x128xf32, #tpu.memory_space<vmem>>, %arg10: memref<128x256xbf16, #tpu.memory_space<vmem>>, %arg11: memref<1x256xf32, #tpu.memory_space<vmem>>, %arg12: memref<128x128xbf16, #tpu.memory_space<vmem>>, %arg13: memref<1x128xf32, #tpu.memory_space<vmem>>, %arg14: memref<1x128xf32, #tpu.memory_space<vmem>>, %arg15: memref<1x128xf32, #tpu.memory_space<vmem>>, %arg16: memref<1x16x128xf32, #tpu.memory_space<vmem>>, %arg17: memref<16x128xbf16, #tpu.memory_space<vmem>>, %arg18: memref<16x128xbf16, #tpu.memory_space<vmem>>, %arg19: memref<16x128xbf16, #tpu.memory_space<vmem>>, %arg20: memref<16x128xbf16, #tpu.memory_space<vmem>>) attributes {dimension_semantics = [#tpu.dimension_semantics<parallel>, #tpu.dimension_semantics<arbitrary>], iteration_bounds = array<i64: 2, 1>, scalar_prefetch = 0 : i64, scratch_operands = 4 : i64, tpu.core_type = #tpu.core_type<tc>, window_params = [{transform_indices = @transform_0, window_bounds = array<i64: 1, 16, 128>}, {transform_indices = @transform_1, window_bounds = array<i64: 1, 16, 128>}, {transform_indices = @transform_2, window_bounds = array<i64: 1, 16, 128>}, {transform_indices = @transform_3, window_bounds = array<i64: 1, 1, 16>}, {pipeline_mode = #tpu.pipeline_mode<synchronous>, transform_indices = @transform_4, window_bounds = array<i64: 128, 256>}, {pipeline_mode = #tpu.pipeline_mode<synchronous>, transform_indices = @transform_5, window_bounds = array<i64: 1, 256>}, {pipeline_mode = #tpu.pipeline_mode<synchronous>, transform_indices = @transform_6, window_bounds = array<i64: 128, 128>}, {pipeline_mode = #tpu.pipeline_mode<synchronous>, transform_indices = @transform_7, window_bounds = array<i64: 1, 128>}, {pipeline_mode = #tpu.pipeline_mode<synchronous>, transform_indices = @transform_8, window_bounds = array<i64: 128, 256>}, {pipeline_mode = #tpu.pipeline_mode<synchronous>, transform_indices = @transform_9, window_bounds = array<i64: 1, 256>}, {pipeline_mode = #tpu.pipeline_mode<synchronous>, transform_indices = @transform_10, window_bounds = array<i64: 128, 128>}, {pipeline_mode = #tpu.pipeline_mode<synchronous>, transform_indices = @transform_11, window_bounds = array<i64: 1, 128>}, {pipeline_mode = #tpu.pipeline_mode<synchronous>, transform_indices = @transform_12, window_bounds = array<i64: 1, 128>}, {pipeline_mode = #tpu.pipeline_mode<synchronous>, transform_indices = @transform_13, window_bounds = array<i64: 1, 128>}, {transform_indices = @transform_14, window_bounds = array<i64: 1, 16, 128>}]} {
    %c0_i32 = arith.constant 0 : i32
    %0 = arith.cmpi eq, %arg1, %c0_i32 : i32
    %1 = arith.extui %0 : i1 to i32
    %c0_i32_0 = arith.constant 0 : i32
    %2 = arith.cmpi ne, %1, %c0_i32_0 : i32
    scf.if %2 {
      %c0_51 = arith.constant 0 : index
      %c0_52 = arith.constant 0 : index
      %c0_53 = arith.constant 0 : index
      %99 = vector.load %arg2[%c0_51, %c0_52, %c0_53] : memref<1x16x128xbf16, #tpu.memory_space<vmem>>, vector<1x16x128xbf16>
      %100 = vector.shape_cast %99 : vector<1x16x128xbf16> to vector<16x128xbf16>
      %c0_54 = arith.constant 0 : index
      %c0_55 = arith.constant 0 : index
      %101 = vector.load %arg6[%c0_54, %c0_55] : memref<128x256xbf16, #tpu.memory_space<vmem>>, vector<128x256xbf16>
      %cst_56 = arith.constant dense<0.000000e+00> : vector<16x256xf32>
      %102 = tpu.matmul %100, %101, %cst_56 {dimension_numbers = #tpu.dot_dimension_numbers<[1], [0], [0], [1], [0, 0, 1, 1], [], []>} : vector<16x128xbf16>, vector<128x256xbf16>, vector<16x256xf32> -> vector<16x256xf32>
      %c0_57 = arith.constant 0 : index
      %c0_58 = arith.constant 0 : index
      %103 = vector.load %arg7[%c0_57, %c0_58] : memref<1x256xf32, #tpu.memory_space<vmem>>, vector<1x256xf32>
      %104 = vector.broadcast %103 : vector<1x256xf32> to vector<16x256xf32>
      %105 = arith.addf %102, %104 : vector<16x256xf32>
      %106 = vector.extract_strided_slice %105 {offsets = [0, 0], sizes = [16, 128], strides = [1, 1]} : vector<16x256xf32> to vector<16x128xf32>
      %107 = arith.truncf %106 : vector<16x128xf32> to vector<16x128xbf16>
      %c0_59 = arith.constant 0 : index
      %c0_60 = arith.constant 0 : index
      %108 = vector.load %arg17[%c0_59, %c0_60] : memref<16x128xbf16, #tpu.memory_space<vmem>>, vector<16x128xbf16>
      tpu.vector_store %arg17[%c0_59, %c0_60], %107 {strides = array<i32>} : memref<16x128xbf16, #tpu.memory_space<vmem>>, vector<16x128xbf16>,
      %109 = vector.extract_strided_slice %105 {offsets = [0, 128], sizes = [16, 128], strides = [1, 1]} : vector<16x256xf32> to vector<16x128xf32>
      %110 = arith.truncf %109 : vector<16x128xf32> to vector<16x128xbf16>
      %c0_61 = arith.constant 0 : index
      %c0_62 = arith.constant 0 : index
      %111 = vector.load %arg18[%c0_61, %c0_62] : memref<16x128xbf16, #tpu.memory_space<vmem>>, vector<16x128xbf16>
      tpu.vector_store %arg18[%c0_61, %c0_62], %110 {strides = array<i32>} : memref<16x128xbf16, #tpu.memory_space<vmem>>, vector<16x128xbf16>,
      %c0_63 = arith.constant 0 : index
      %c0_64 = arith.constant 0 : index
      %c0_65 = arith.constant 0 : index
      %112 = vector.load %arg3[%c0_63, %c0_64, %c0_65] : memref<1x16x128xbf16, #tpu.memory_space<vmem>>, vector<1x16x128xbf16>
      %113 = vector.shape_cast %112 : vector<1x16x128xbf16> to vector<16x128xbf16>
      %c0_66 = arith.constant 0 : index
      %c0_67 = arith.constant 0 : index
      %114 = vector.load %arg10[%c0_66, %c0_67] : memref<128x256xbf16, #tpu.memory_space<vmem>>, vector<128x256xbf16>
      %cst_68 = arith.constant dense<0.000000e+00> : vector<16x256xf32>
      %115 = tpu.matmul %113, %114, %cst_68 {dimension_numbers = #tpu.dot_dimension_numbers<[1], [0], [0], [1], [0, 0, 1, 1], [], []>} : vector<16x128xbf16>, vector<128x256xbf16>, vector<16x256xf32> -> vector<16x256xf32>
      %c0_69 = arith.constant 0 : index
      %c0_70 = arith.constant 0 : index
      %116 = vector.load %arg11[%c0_69, %c0_70] : memref<1x256xf32, #tpu.memory_space<vmem>>, vector<1x256xf32>
      %117 = vector.broadcast %116 : vector<1x256xf32> to vector<16x256xf32>
      %118 = arith.addf %115, %117 : vector<16x256xf32>
      %119 = vector.extract_strided_slice %118 {offsets = [0, 0], sizes = [16, 128], strides = [1, 1]} : vector<16x256xf32> to vector<16x128xf32>
      %120 = arith.truncf %119 : vector<16x128xf32> to vector<16x128xbf16>
      %c0_71 = arith.constant 0 : index
      %c0_72 = arith.constant 0 : index
      %121 = vector.load %arg19[%c0_71, %c0_72] : memref<16x128xbf16, #tpu.memory_space<vmem>>, vector<16x128xbf16>
      tpu.vector_store %arg19[%c0_71, %c0_72], %120 {strides = array<i32>} : memref<16x128xbf16, #tpu.memory_space<vmem>>, vector<16x128xbf16>,
      %122 = vector.extract_strided_slice %118 {offsets = [0, 128], sizes = [16, 128], strides = [1, 1]} : vector<16x256xf32> to vector<16x128xf32>
      %123 = arith.truncf %122 : vector<16x128xf32> to vector<16x128xbf16>
      %c0_73 = arith.constant 0 : index
      %c0_74 = arith.constant 0 : index
      %124 = vector.load %arg20[%c0_73, %c0_74] : memref<16x128xbf16, #tpu.memory_space<vmem>>, vector<16x128xbf16>
      tpu.vector_store %arg20[%c0_73, %c0_74], %123 {strides = array<i32>} : memref<16x128xbf16, #tpu.memory_space<vmem>>, vector<16x128xbf16>,
    } else {
    }
    %c0 = arith.constant 0 : index
    %c0_1 = arith.constant 0 : index
    %c0_2 = arith.constant 0 : index
    %3 = vector.load %arg5[%c0, %c0_1, %c0_2] : memref<1x1x16xf32, #tpu.memory_space<vmem>>, vector<1x1x16xf32>
    %4 = vector.shape_cast %3 : vector<1x1x16xf32> to vector<1x16xf32>
    %cst = arith.constant 0.000000e+00 : f32
    %5 = vector.broadcast %cst : f32 to vector<1x16xf32>
    %6 = arith.cmpf ogt, %4, %5 : vector<1x16xf32>
    %cst_3 = arith.constant 0.000000e+00 : f32
    %cst_4 = arith.constant -1.000000e+30 : f32
    %7 = vector.broadcast %cst_3 : f32 to vector<1x16xf32>
    %8 = vector.broadcast %cst_4 : f32 to vector<1x16xf32>
    %9 = arith.select %6, %7, %8 : vector<1x16xi1>, vector<1x16xf32>
    %c0_5 = arith.constant 0 : index
    %c0_6 = arith.constant 0 : index
    %c0_7 = arith.constant 0 : index
    %10 = vector.load %arg4[%c0_5, %c0_6, %c0_7] : memref<1x16x128xbf16, #tpu.memory_space<vmem>>, vector<1x16x128xbf16>
    %11 = vector.shape_cast %10 : vector<1x16x128xbf16> to vector<16x128xbf16>
    %c0_8 = arith.constant 0 : index
    %c0_9 = arith.constant 0 : index
    %12 = vector.load %arg8[%c0_8, %c0_9] : memref<128x128xbf16, #tpu.memory_space<vmem>>, vector<128x128xbf16>
    %cst_10 = arith.constant dense<0.000000e+00> : vector<16x128xf32>
    %13 = tpu.matmul %11, %12, %cst_10 {dimension_numbers = #tpu.dot_dimension_numbers<[1], [0], [0], [1], [0, 0, 1, 1], [], []>} : vector<16x128xbf16>, vector<128x128xbf16>, vector<16x128xf32> -> vector<16x128xf32>
    %c0_11 = arith.constant 0 : index
    %c0_12 = arith.constant 0 : index
    %14 = vector.load %arg9[%c0_11, %c0_12] : memref<1x128xf32, #tpu.memory_space<vmem>>, vector<1x128xf32>
    %15 = vector.broadcast %14 : vector<1x128xf32> to vector<16x128xf32>
    %16 = arith.addf %13, %15 : vector<16x128xf32>
    %cst_13 = arith.constant 0.176776692 : f32
    %17 = vector.broadcast %cst_13 : f32 to vector<16x128xf32>
    %18 = arith.mulf %16, %17 : vector<16x128xf32>
    %19 = arith.truncf %18 : vector<16x128xf32> to vector<16x128xbf16>
    %c0_14 = arith.constant 0 : index
    %c0_15 = arith.constant 0 : index
    %20 = vector.load %arg17[%c0_14, %c0_15] : memref<16x128xbf16, #tpu.memory_space<vmem>>, vector<16x128xbf16>
    %cst_16 = arith.constant dense<0.000000e+00> : vector<16x16xf32>
    %21 = tpu.matmul %19, %20, %cst_16 {dimension_numbers = #tpu.dot_dimension_numbers<[1], [1], [0], [0], [0, 0, 1, 0], [], []>} : vector<16x128xbf16>, vector<16x128xbf16>, vector<16x16xf32> -> vector<16x16xf32>
    %22 = vector.broadcast %9 : vector<1x16xf32> to vector<16x16xf32>
    %23 = arith.addf %21, %22 : vector<16x16xf32>
    %cst_17 = arith.constant dense<0xFF800000> : vector<16xf32>
    %24 = vector.multi_reduction <maximumf>, %23, %cst_17 [1] : vector<16x16xf32> to vector<16xf32>
    %25 = vector.shape_cast %24 : vector<16xf32> to vector<16x1xf32>
    %26 = vector.broadcast %25 : vector<16x1xf32> to vector<16x16xf32>
    %27 = arith.subf %23, %26 : vector<16x16xf32>
    %28 = math.exp %27 : vector<16x16xf32>
    %cst_18 = arith.constant dense<0.000000e+00> : vector<16xf32>
    %29 = vector.multi_reduction <add>, %28, %cst_18 [1] : vector<16x16xf32> to vector<16xf32>
    %30 = vector.shape_cast %29 : vector<16xf32> to vector<16x1xf32>
    %31 = arith.truncf %28 : vector<16x16xf32> to vector<16x16xbf16>
    %c0_19 = arith.constant 0 : index
    %c0_20 = arith.constant 0 : index
    %32 = vector.load %arg18[%c0_19, %c0_20] : memref<16x128xbf16, #tpu.memory_space<vmem>>, vector<16x128xbf16>
    %cst_21 = arith.constant dense<0.000000e+00> : vector<16x128xf32>
    %33 = tpu.matmul %31, %32, %cst_21 {dimension_numbers = #tpu.dot_dimension_numbers<[1], [0], [0], [1], [0, 0, 1, 1], [], []>} : vector<16x16xbf16>, vector<16x128xbf16>, vector<16x128xf32> -> vector<16x128xf32>
    %34 = tpu.reciprocal %30 {approx = true} : vector<16x1xf32> -> vector<16x1xf32>
    %35 = vector.broadcast %34 : vector<16x1xf32> to vector<16x128xf32>
    %36 = arith.mulf %33, %35 : vector<16x128xf32>
    %cst_22 = arith.constant 0.000000e+00 : f32
    %37 = vector.broadcast %cst_22 : f32 to vector<16x128xf32>
    %38 = arith.maximumf %36, %37 : vector<16x128xf32>
    %39 = arith.truncf %38 : vector<16x128xf32> to vector<16x128xbf16>
    %c0_23 = arith.constant 0 : index
    %c0_24 = arith.constant 0 : index
    %40 = vector.load %arg12[%c0_23, %c0_24] : memref<128x128xbf16, #tpu.memory_space<vmem>>, vector<128x128xbf16>
    %cst_25 = arith.constant dense<0.000000e+00> : vector<16x128xf32>
    %41 = tpu.matmul %39, %40, %cst_25 {dimension_numbers = #tpu.dot_dimension_numbers<[1], [0], [0], [1], [0, 0, 1, 1], [], []>} : vector<16x128xbf16>, vector<128x128xbf16>, vector<16x128xf32> -> vector<16x128xf32>
    %c0_26 = arith.constant 0 : index
    %c0_27 = arith.constant 0 : index
    %42 = vector.load %arg13[%c0_26, %c0_27] : memref<1x128xf32, #tpu.memory_space<vmem>>, vector<1x128xf32>
    %43 = vector.broadcast %42 : vector<1x128xf32> to vector<16x128xf32>
    %44 = arith.addf %41, %43 : vector<16x128xf32>
    %cst_28 = arith.constant 0.176776692 : f32
    %45 = vector.broadcast %cst_28 : f32 to vector<16x128xf32>
    %46 = arith.mulf %44, %45 : vector<16x128xf32>
    %47 = arith.truncf %46 : vector<16x128xf32> to vector<16x128xbf16>
    %c0_29 = arith.constant 0 : index
    %c0_30 = arith.constant 0 : index
    %48 = vector.load %arg19[%c0_29, %c0_30] : memref<16x128xbf16, #tpu.memory_space<vmem>>, vector<16x128xbf16>
    %cst_31 = arith.constant dense<0.000000e+00> : vector<16x16xf32>
    %49 = tpu.matmul %47, %48, %cst_31 {dimension_numbers = #tpu.dot_dimension_numbers<[1], [1], [0], [0], [0, 0, 1, 0], [], []>} : vector<16x128xbf16>, vector<16x128xbf16>, vector<16x16xf32> -> vector<16x16xf32>
    %50 = vector.broadcast %9 : vector<1x16xf32> to vector<16x16xf32>
    %51 = arith.addf %49, %50 : vector<16x16xf32>
    %cst_32 = arith.constant dense<0xFF800000> : vector<16xf32>
    %52 = vector.multi_reduction <maximumf>, %51, %cst_32 [1] : vector<16x16xf32> to vector<16xf32>
    %53 = vector.shape_cast %52 : vector<16xf32> to vector<16x1xf32>
    %54 = vector.broadcast %53 : vector<16x1xf32> to vector<16x16xf32>
    %55 = arith.subf %51, %54 : vector<16x16xf32>
    %56 = math.exp %55 : vector<16x16xf32>
    %cst_33 = arith.constant dense<0.000000e+00> : vector<16xf32>
    %57 = vector.multi_reduction <add>, %56, %cst_33 [1] : vector<16x16xf32> to vector<16xf32>
    %58 = vector.shape_cast %57 : vector<16xf32> to vector<16x1xf32>
    %59 = arith.truncf %56 : vector<16x16xf32> to vector<16x16xbf16>
    %c0_34 = arith.constant 0 : index
    %c0_35 = arith.constant 0 : index
    %60 = vector.load %arg20[%c0_34, %c0_35] : memref<16x128xbf16, #tpu.memory_space<vmem>>, vector<16x128xbf16>
    %cst_36 = arith.constant dense<0.000000e+00> : vector<16x128xf32>
    %61 = tpu.matmul %59, %60, %cst_36 {dimension_numbers = #tpu.dot_dimension_numbers<[1], [0], [0], [1], [0, 0, 1, 1], [], []>} : vector<16x16xbf16>, vector<16x128xbf16>, vector<16x128xf32> -> vector<16x128xf32>
    %62 = tpu.reciprocal %58 {approx = true} : vector<16x1xf32> -> vector<16x1xf32>
    %63 = vector.broadcast %62 : vector<16x1xf32> to vector<16x128xf32>
    %64 = arith.mulf %61, %63 : vector<16x128xf32>
    %cst_37 = arith.constant 0.000000e+00 : f32
    %65 = vector.broadcast %cst_37 : f32 to vector<16x128xf32>
    %66 = arith.maximumf %64, %65 : vector<16x128xf32>
    %cst_38 = arith.constant dense<0.000000e+00> : vector<16xf32>
    %67 = vector.multi_reduction <add>, %66, %cst_38 [1] : vector<16x128xf32> to vector<16xf32>
    %68 = vector.shape_cast %67 : vector<16xf32> to vector<16x1xf32>
    %cst_39 = arith.constant 3.125000e-02 : f32
    %69 = vector.broadcast %cst_39 : f32 to vector<16x1xf32>
    %70 = arith.mulf %68, %69 : vector<16x1xf32>
    %71 = vector.broadcast %70 : vector<16x1xf32> to vector<16x128xf32>
    %72 = arith.subf %66, %71 : vector<16x128xf32>
    %73 = tpu.iota {dimensions = array<i32: 1>} : vector<1x128xi32>
    %c32_i32 = arith.constant 32 : i32
    %74 = vector.broadcast %c32_i32 : i32 to vector<1x128xi32>
    %75 = arith.cmpi slt, %73, %74 : vector<1x128xi32>
    %76 = arith.mulf %72, %72 : vector<16x128xf32>
    %cst_40 = arith.constant 0.000000e+00 : f32
    %77 = vector.shape_cast %75 : vector<1x128xi1> to vector<1x128xi1>
    %78 = vector.broadcast %77 : vector<1x128xi1> to vector<16x128xi1>
    %79 = vector.broadcast %cst_40 : f32 to vector<16x128xf32>
    %80 = arith.select %78, %76, %79 : vector<16x128xi1>, vector<16x128xf32>
    %cst_41 = arith.constant dense<0.000000e+00> : vector<16xf32>
    %81 = vector.multi_reduction <add>, %80, %cst_41 [1] : vector<16x128xf32> to vector<16xf32>
    %82 = vector.shape_cast %81 : vector<16xf32> to vector<16x1xf32>
    %cst_42 = arith.constant 3.125000e-02 : f32
    %83 = vector.broadcast %cst_42 : f32 to vector<16x1xf32>
    %84 = arith.mulf %82, %83 : vector<16x1xf32>
    %cst_43 = arith.constant 9.99999974E-6 : f32
    %85 = vector.broadcast %cst_43 : f32 to vector<16x1xf32>
    %86 = arith.addf %84, %85 : vector<16x1xf32>
    %87 = math.rsqrt %86 : vector<16x1xf32>
    %88 = vector.broadcast %87 : vector<16x1xf32> to vector<16x128xf32>
    %89 = arith.mulf %72, %88 : vector<16x128xf32>
    %c0_44 = arith.constant 0 : index
    %c0_45 = arith.constant 0 : index
    %90 = vector.load %arg14[%c0_44, %c0_45] : memref<1x128xf32, #tpu.memory_space<vmem>>, vector<1x128xf32>
    %91 = vector.broadcast %90 : vector<1x128xf32> to vector<16x128xf32>
    %92 = arith.mulf %89, %91 : vector<16x128xf32>
    %c0_46 = arith.constant 0 : index
    %c0_47 = arith.constant 0 : index
    %93 = vector.load %arg15[%c0_46, %c0_47] : memref<1x128xf32, #tpu.memory_space<vmem>>, vector<1x128xf32>
    %94 = vector.broadcast %93 : vector<1x128xf32> to vector<16x128xf32>
    %95 = arith.addf %92, %94 : vector<16x128xf32>
    %c0_48 = arith.constant 0 : index
    %c0_49 = arith.constant 0 : index
    %c0_50 = arith.constant 0 : index
    %96 = vector.load %arg16[%c0_48, %c0_49, %c0_50] : memref<1x16x128xf32, #tpu.memory_space<vmem>>, vector<1x16x128xf32>
    %97 = vector.shape_cast %96 : vector<1x16x128xf32> to vector<16x128xf32>
    %98 = vector.shape_cast %95 : vector<16x128xf32> to vector<1x16x128xf32>
    tpu.vector_store %arg16[%c0_48, %c0_49, %c0_50], %98 {strides = array<i32>} : memref<1x16x128xf32, #tpu.memory_space<vmem>>, vector<1x16x128xf32>,
    return
  }
  func.func @transform_0(%arg0: i32, %arg1: i32) -> (i32, i32, i32) {
    %c0_i32 = arith.constant 0 : i32
    %c0_i32_0 = arith.constant 0 : i32
    %c0_i32_1 = arith.constant 0 : i32
    return %arg0, %c0_i32, %c0_i32_0 : i32, i32, i32
  }
  func.func @transform_1(%arg0: i32, %arg1: i32) -> (i32, i32, i32) {
    %c0_i32 = arith.constant 0 : i32
    %c0_i32_0 = arith.constant 0 : i32
    %c0_i32_1 = arith.constant 0 : i32
    return %arg0, %c0_i32, %c0_i32_0 : i32, i32, i32
  }
  func.func @transform_2(%arg0: i32, %arg1: i32) -> (i32, i32, i32) {
    %c0_i32 = arith.constant 0 : i32
    %c0_i32_0 = arith.constant 0 : i32
    return %arg0, %arg1, %c0_i32 : i32, i32, i32
  }
  func.func @transform_3(%arg0: i32, %arg1: i32) -> (i32, i32, i32) {
    %c0_i32 = arith.constant 0 : i32
    %c0_i32_0 = arith.constant 0 : i32
    %c0_i32_1 = arith.constant 0 : i32
    return %arg0, %c0_i32, %c0_i32_0 : i32, i32, i32
  }
  func.func @transform_4(%arg0: i32, %arg1: i32) -> (i32, i32) {
    %c0_i32 = arith.constant 0 : i32
    %c0_i32_0 = arith.constant 0 : i32
    %c0_i32_1 = arith.constant 0 : i32
    return %c0_i32, %c0_i32_0 : i32, i32
  }
  func.func @transform_5(%arg0: i32, %arg1: i32) -> (i32, i32) {
    %c0_i32 = arith.constant 0 : i32
    %c0_i32_0 = arith.constant 0 : i32
    %c0_i32_1 = arith.constant 0 : i32
    return %c0_i32, %c0_i32_0 : i32, i32
  }
  func.func @transform_6(%arg0: i32, %arg1: i32) -> (i32, i32) {
    %c0_i32 = arith.constant 0 : i32
    %c0_i32_0 = arith.constant 0 : i32
    %c0_i32_1 = arith.constant 0 : i32
    return %c0_i32, %c0_i32_0 : i32, i32
  }
  func.func @transform_7(%arg0: i32, %arg1: i32) -> (i32, i32) {
    %c0_i32 = arith.constant 0 : i32
    %c0_i32_0 = arith.constant 0 : i32
    %c0_i32_1 = arith.constant 0 : i32
    return %c0_i32, %c0_i32_0 : i32, i32
  }
  func.func @transform_8(%arg0: i32, %arg1: i32) -> (i32, i32) {
    %c0_i32 = arith.constant 0 : i32
    %c0_i32_0 = arith.constant 0 : i32
    %c0_i32_1 = arith.constant 0 : i32
    return %c0_i32, %c0_i32_0 : i32, i32
  }
  func.func @transform_9(%arg0: i32, %arg1: i32) -> (i32, i32) {
    %c0_i32 = arith.constant 0 : i32
    %c0_i32_0 = arith.constant 0 : i32
    %c0_i32_1 = arith.constant 0 : i32
    return %c0_i32, %c0_i32_0 : i32, i32
  }
  func.func @transform_10(%arg0: i32, %arg1: i32) -> (i32, i32) {
    %c0_i32 = arith.constant 0 : i32
    %c0_i32_0 = arith.constant 0 : i32
    %c0_i32_1 = arith.constant 0 : i32
    return %c0_i32, %c0_i32_0 : i32, i32
  }
  func.func @transform_11(%arg0: i32, %arg1: i32) -> (i32, i32) {
    %c0_i32 = arith.constant 0 : i32
    %c0_i32_0 = arith.constant 0 : i32
    %c0_i32_1 = arith.constant 0 : i32
    return %c0_i32, %c0_i32_0 : i32, i32
  }
  func.func @transform_12(%arg0: i32, %arg1: i32) -> (i32, i32) {
    %c0_i32 = arith.constant 0 : i32
    %c0_i32_0 = arith.constant 0 : i32
    %c0_i32_1 = arith.constant 0 : i32
    return %c0_i32, %c0_i32_0 : i32, i32
  }
  func.func @transform_13(%arg0: i32, %arg1: i32) -> (i32, i32) {
    %c0_i32 = arith.constant 0 : i32
    %c0_i32_0 = arith.constant 0 : i32
    %c0_i32_1 = arith.constant 0 : i32
    return %c0_i32, %c0_i32_0 : i32, i32
  }
  func.func @transform_14(%arg0: i32, %arg1: i32) -> (i32, i32, i32) {
    %c0_i32 = arith.constant 0 : i32
    %c0_i32_0 = arith.constant 0 : i32
    return %arg0, %arg1, %c0_i32 : i32, i32, i32
  }
}

</mosaic_0001>

<bundles_post_ra>
// kernel: tpu_custom_call.1
= control target key start
LH: loop header
LB: loop body
LE: loop exit
PB: predicated region body
PF: predicated region fallthrough
CT: control target
= control target key end

     0   :  { %s2922_s0 = inlined_call_operand.hbm [shape: bf16[2,16,128], index: 0, kind: input, shape index: {}]   ;;  %s2923_s1 = inlined_call_operand.hbm [shape: bf16[2,16,128], index: 1, kind: input, shape index: {}]   ;;  %s2924_s2 = inlined_call_operand.hbm [shape: bf16[2,16,128], index: 2, kind: input, shape index: {}]   ;;  %s2925_s3 = inlined_call_operand.vmem [shape: f32[2,1,16], index: 3, kind: input, shape index: {}]   ;;  %s2926_s4 = inlined_call_operand.hbm [shape: bf16[128,256], index: 4, kind: input, shape index: {}]   ;;  %s2927_s5 = inlined_call_operand.vmem [shape: f32[1,256], index: 5, kind: input, shape index: {}]   ;;  %s2928_s6 = inlined_call_operand.hbm [shape: bf16[128,128], index: 6, kind: input, shape index: {}]   ;;  %s2929_s7 = inlined_call_operand.vmem [shape: f32[1,128], index: 7, kind: input, shape index: {}]   ;;  %s2930_s8 = inlined_call_operand.hbm [shape: bf16[128,256], index: 8, kind: input, shape index: {}]   ;;  %s2931_s9 = inlined_call_operand.vmem [shape: f32[1,256], index: 9, kind: input, shape index: {}]   ;;  %s2932_s10 = inlined_call_operand.hbm [shape: bf16[128,128], index: 10, kind: input, shape index: {}]   ;;  %s2933_s11 = inlined_call_operand.vmem [shape: f32[1,128], index: 11, kind: input, shape index: {}]   ;;  %s2934_s12 = inlined_call_operand.vmem [shape: f32[1,128], index: 12, kind: input, shape index: {}]   ;;  %s2935_s13 = inlined_call_operand.vmem [shape: f32[1,128], index: 13, kind: input, shape index: {}]   ;;  %s2936_s14 = inlined_call_operand.hbm [shape: f32[2,16,128], index: 14, kind: output, shape index: {}]  }
   0x1   :  { %2949 = sst [smem:[#allocation31_spill]] %s2923_s1 }
   0x2   :  { %2950 = sst [smem:[#allocation32_spill]] %s2925_s3 }
   0x3   :  { %2951 = sst [smem:[#allocation33_spill]] %s2926_s4 }
   0x4   :  { %2952 = sst [smem:[#allocation34_spill]] %s2928_s6 }
   0x5   :  { %2953 = sst [smem:[#allocation35_spill]] %s2930_s8 }
   0x6   :  { %2954 = sst [smem:[#allocation36_spill]] %s2933_s11 }
   0x7   :  { %2955 = sst [smem:[#allocation37_spill]] %s2934_s12 }
   0x8   :  { %2956 = sst [smem:[#allocation38_spill]] %s2935_s13 }
   0x9   :  { %2957 = sst [smem:[#allocation39_spill]] %s2936_s14 }
   0xa   :  { %19 = vsyncpa [#allocation7], 0 }
   0xb   :  { %21 = vsyncpa [#allocation7 + $0x1], 0 }
   0xc   :  { %22 = vsyncpa [#allocation10], 0 }
   0xd   :  { %24 = vsyncpa [#allocation10 + $0x1], 0 }
   0xe   :  { %25 = vsyncpa [#allocation13], 0 }
   0xf   :  { %26 = vsyncpa [#allocation16], 0 }
  0x10   :  { %27 = vsyncpa [#allocation8], 0 }
  0x11   :  { %29 = vsyncpa [#allocation8 + $0x1], 0  ;;  %s2572_s29 = smov 0   ;;  %s2574_s30 = smov 0  }
  0x12   :  { %s2576_s15 = smov 0   ;;  %s2578_s16 = smov 0  }
  0x13   :  { %s2580_s17 = smov 0   ;;  %s2582_s18 = smov 0  }
  0x14 LB: > { %2958 = sst [smem:[#allocation24_spill]] %s2457_s29  ;;  %s2603_s19 = sadd.s32 4294967295, %s2477_s18   ;;  %s2477_s18 = sphi %s2582_s18, %s35_s18   ;;  %s2473_s17 = sphi %s2580_s17, %s2996_s17   ;;  %s2469_s16 = sphi %s2578_s16, %s2995_s16   ;;  %s2465_s15 = sphi %s2576_s15, %s2999_s15   ;;  %s2461_s30 = sphi %s2574_s30, %s2998_s30   ;;  %s2457_s29 = sphi %s2572_s29, %s2997_s29  }
  0x15   : > { %2959 = sst [smem:[#allocation25_spill]] %s2473_s17  ;;  %s1762_s20 = sadd.s32 4294967294, %s2477_s18  }
  0x16   : > { %2960 = sst [smem:[#allocation26_spill]] %s2477_s18  ;;  %p67_p0 = scmp.ne.s32.totalorder %s2461_s30, %s2457_s29 }
  0x17   : > { %p2940_p1 = scmp.eq.s32.totalorder %s2603_s19, 0  ;;  %p389_p3 = scmp.eq.s32.totalorder %s1762_s20, 1 }
  0x18   : > { %p1763_p5 = scmp.ge.s32.totalorder %s2477_s18, 1  ;;  %p396_p7 = scmp.lt.s32.totalorder %s2477_s18, 3 }
  0x19   : > { %p2612_p4 = por %p2940_p1, %p67_p0  ;;  %p2617_p6 = por %p389_p3, %p67_p0 }
  0x1a   : > { %p2622_p8 = pnand %p1763_p5, %p396_p7  ;;  %s2479_s24 = smov [#allocation12]  }
  0x1b   : > { %s2962_s22 = scalar_select %p2617_p6, 1, 0 }
  0x1c   : > { %s408_s25 = sshll.u32 %s2479_s24, 4  ;;  %p2007_p9 = pneg %p2622_p8  ;;  %s409_s25 = int_to_ptr.vmem [resolvable:$true] %s408_s25 }
  0x1d   : > { %2963 = sst [smem:[#allocation27_spill]] %s2962_s22  ;;  %s2480_s27 = smov [#allocation15]  }
  0x1e   : > { %p2631_p11 = pnand %p2007_p9, %p2940_p1  ;;  %s440_s28 = sshll.u32 %s2480_s27, 4  ;;  %s441_s28 = int_to_ptr.vmem [resolvable:$true] %s440_s28 }
  0x1f   : > { %s2208_s20 = scalar_lea.vmem %s409_s25, 2048  ;;  %p2216_p5 = scmp.lt.s32.totalorder %s409_s25, %s409_s25 }
  0x20   : > { %p2199_p12 = pneg %p2631_p11  ;;  %p2209_p13 = scmp.ne.s32.totalorder %s409_s25, %s2208_s20 }
  0x21   : > { %p2217_p7 = scmp.lt.s32.totalorder %s2208_s20, %s2208_s20 }
  0x22   : > { %p2211_p0 = pnand %p2209_p13, %p2199_p12 }
  0x23   : > { %p2218_p10 = por %p2217_p7, %p2216_p5 }
  0x24   : > { %p2212_p3 = pneg %p2211_p0 }
  0x26   : > { %p2219_p9 = pnand %p2218_p10, %p2212_p3 }
  0x28   : > { %2222 = shalt.err (!%p2219_p9)
}
  0x29   : > { %s2481_s24 = smov 128   ;;  %s2482_s22 = smov 8  }
  0x2a   : > { %s2966_s4 = sld [smem:[#allocation33_spill]]  ;;  %s2234_s14 = scalar_lea.vmem %s441_s28, 2048 }
  0x2b   : > { %p2235_p1 = scmp.ne.s32.totalorder %s441_s28, %s2234_s14  ;;  %p2242_p2 = scmp.lt.s32.totalorder %s441_s28, %s441_s28 }
  0x2c   : > { %p2243_p6 = scmp.lt.s32.totalorder %s2234_s14, %s2234_s14 }
  0x2d   : > { %p2237_p13 = pnand %p2235_p1, %p2199_p12 }
  0x2e   : > { %p2244_p5 = por %p2243_p6, %p2242_p2 }
  0x2f   : > { %p2238_p0 = pneg %p2237_p13 }
  0x30   : > { %2010 = dma.hbm_to_vmem [thread:$0]  (!%p2631_p11), %s2966_s4, 2048, %s409_s25, [#allocation13], %s2481_s24, %s2481_s24, %s2482_s22  }
  0x31   : > { %p2245_p10 = pnand %p2244_p5, %p2238_p0 }
  0x33   : > { %2248 = shalt.err (!%p2245_p10)
}
  0x34   : > { %s2967_s8 = sld [smem:[#allocation35_spill]]  ;;  %s47_s14 = sadd.s32 1, %s2473_s17 }
  0x35   : > { %s54_s29 = sadd.s32 1, %s2465_s15  ;;  %p49_p1 = scmp.ge.s32.totalorder %s47_s14, 2 }
  0x36   : > { %p61_p2 = scmp.ne.s32.totalorder %s2465_s15, %s2461_s30  ;;  %p62_p6 = scmp.eq.s32.totalorder %s2477_s18, 0 }
  0x37   : > { %s3001_s14 = smov (%p49_p1, %s47_s14), 0  ;;  %p2969_p7 = scmp.eq.s32.totalorder %s2603_s19, 1 }
  0x38   : > { %2968 = sst [smem:[#allocation28_spill]] %s3001_s14  ;;  %p63_p3 = por %p62_p6, %p61_p2 }
  0x39   : > { %p2662_p9 = por %p2969_p7, %p61_p2  ;;  %s51_s25 = ssub.s32 %s2473_s17, %s3001_s14 }
  0x3a   : > { %2016 = dma.hbm_to_vmem [thread:$0]  (!%p2631_p11), %s2967_s8, 2048, %s441_s28, [#allocation16], %s2481_s24, %s2481_s24, %s2482_s22  }
  0x3b   : > { %s2970_s13 = scalar_select %p2662_p9, 1, 0 }
  0x3c   : > { %p52_p13 = scmp.eq.s32.totalorder %s51_s25, 0  ;;  %p2038_p0 = scmp.lt.s32.totalorder %s2477_s18, 2 }
  0x3d   : > { %2971 = sst [smem:[#allocation29_spill]] %s2970_s13  ;;  %s2945_s27 = sand.u32 1, %s2465_s15  }
  0x3e   : > { %s2671_s22 = sshll.u32 %s2473_s17, 7  ;;  %s2678_s24 = sshll.u32 %s2945_s27, 3 }
  0x3f   : > { %s2674_s28 = scalar_select %p52_p13, %s2465_s15, %s54_s29  }
  0x40   : > { %p2680_p5 = pnand %p2038_p0, %p63_p3  ;;  %s500_s4 = sand.u32 1, %s2477_s18  }
  0x41   : > { %2972 = sst [smem:[#allocation30_spill]] %s2674_s28  ;;  %s504_s17 = scalar_lea.vmem [#allocation9], %s2678_s24 }
  0x42   : > { %s2974_s1 = sld [smem:[#allocation31_spill]]  ;;  %s511_s13 = sshll.u32 %s504_s17, 4  ;;  %s512_s13 = int_to_ptr.vmem [resolvable:$true] %s511_s13 }
  0x43   : > { %s2690_s29 = scalar_lea.sflag [#allocation10], %s500_s4  ;;  %p2948_p10 = pneg %p2680_p5 }
  0x44   : > { %s2262_s27 = scalar_lea.vmem %s512_s13, 128  ;;  %s2483_s28 = smov [#allocation9]  }
  0x45   : > { %p2263_p1 = scmp.ne.s32.totalorder %s512_s13, %s2262_s27  ;;  %s2267_s12 = sshll.u32 %s2483_s28, 4  ;;  %s2268_s12 = int_to_ptr.vmem [resolvable:$false] %s2267_s12 }
  0x46   : > { %s2269_s18 = scalar_lea.vmem %s2268_s12, 256  ;;  %p2270_p3 = scmp.lt.s32.totalorder %s512_s13, %s2268_s12 }
  0x47   : > { %p2265_p2 = pnand %p2263_p1, %p2948_p10  ;;  %p2271_p7 = scmp.lt.s32.totalorder %s2269_s18, %s2262_s27 }
  0x48   : > { %s510_s14 = scalar_lea.hbm %s2974_s1, %s2671_s22 }
  0x49   : > { %p2266_p6 = pneg %p2265_p2  ;;  %p2272_p13 = por %p2271_p7, %p2270_p3 }
  0x4b   : > { %p2273_p0 = pnand %p2272_p13, %p2266_p6 }
  0x4d   : > { %2276 = shalt.err (!%p2273_p0)
}
  0x4e   : > { %s2484_s8 = smov 64   ;;  %s2485_s4 = smov 4  }
  0x4f   : > { %2026 = dma.hbm_to_vmem [thread:$0]  (!%p2680_p5), %s510_s14, 128, %s512_s13, %s2690_s29, %s2484_s8, %s2484_s8, %s2485_s4  }
  0x50   : > { %s2486_s17 = smov [#allocation14]   ;;  %s2487_s28 = smov [#allocation17]  }
  0x51   : > { %s424_s25 = sshll.u32 %s2486_s17, 4  ;;  %s456_s1 = sshll.u32 %s2487_s28, 4  ;;  %s425_s25 = int_to_ptr.vmem [resolvable:$true] %s424_s25  ;;  %s457_s1 = int_to_ptr.vmem [resolvable:$true] %s456_s1 }
  0x52   : > { %s2288_s12 = scalar_lea.vmem %s425_s25, 1024  ;;  %p2296_p3 = scmp.lt.s32.totalorder %s425_s25, %s425_s25 }
  0x53   : > { %p2289_p1 = scmp.ne.s32.totalorder %s425_s25, %s2288_s12  ;;  %p2297_p7 = scmp.lt.s32.totalorder %s2288_s12, %s2288_s12 }
  0x55   : > { %p2291_p2 = pnand %p2289_p1, %p2199_p12  ;;  %p2298_p13 = por %p2297_p7, %p2296_p3 }
  0x57   : > { %p2292_p6 = pneg %p2291_p2 }
  0x59   : > { %p2299_p0 = pnand %p2298_p13, %p2292_p6 }
  0x5b   : > { %2302 = shalt.err (!%p2299_p0)
}
  0x5c   : > { %s2975_s6 = sld [smem:[#allocation34_spill]]  ;;  %s2314_s13 = scalar_lea.vmem %s457_s1, 1024 }
  0x5d   : > { %p2315_p10 = scmp.ne.s32.totalorder %s457_s1, %s2314_s13  ;;  %p2322_p3 = scmp.lt.s32.totalorder %s457_s1, %s457_s1 }
  0x5e   : > { %p2323_p6 = scmp.lt.s32.totalorder %s2314_s13, %s2314_s13 }
  0x5f   : > { %p2317_p1 = pnand %p2315_p10, %p2199_p12 }
  0x60   : > { %p2324_p7 = por %p2323_p6, %p2322_p3 }
  0x61   : > { %p2318_p2 = pneg %p2317_p1 }
  0x62   : > { %2013 = dma.hbm_to_vmem [thread:$0]  (!%p2631_p11), %s2975_s6, 1024, %s425_s25, [#allocation13], %s2484_s8, %s2484_s8, %s2485_s4  }
  0x63   : > { %p2325_p13 = pnand %p2324_p7, %p2318_p2 }
  0x65   : > { %2328 = shalt.err (!%p2325_p13)
}
  0x66   : > { %2019 = dma.hbm_to_vmem [thread:$0]  (!%p2631_p11), %s2932_s10, 1024, %s457_s1, [#allocation16], %s2484_s8, %s2484_s8, %s2485_s4  }
  0x67   : > { %s489_s12 = scalar_lea.hbm %s2922_s0, %s2671_s22  ;;  %s483_s18 = scalar_lea.vmem [#allocation6], %s2678_s24 }
  0x68   : > { %s490_s14 = sshll.u32 %s483_s18, 4  ;;  %s533_s6 = scalar_lea.hbm %s2924_s2, %s2671_s22  ;;  %s491_s14 = int_to_ptr.vmem [resolvable:$true] %s490_s14 }
  0x69   : > { %s2976_s11 = sand.u32 1, %s2465_s15   ;;  %s2342_s27 = scalar_lea.vmem %s491_s14, 128 }
  0x6a   : > { %s480_s3 = scalar_lea.sflag [#allocation7], %s2976_s11  ;;  %p2343_p12 = scmp.ne.s32.totalorder %s491_s14, %s2342_s27 }
  0x6b   : > { %p2977_p10 = pneg %p2680_p5  ;;  %s2488_s1 = smov [#allocation6]  }
  0x6c   : > { %s2347_s17 = sshll.u32 %s2488_s1, 4  ;;  %s2348_s17 = int_to_ptr.vmem [resolvable:$false] %s2347_s17 }
  0x6d   : > { %p2345_p0 = pnand %p2343_p12, %p2977_p10  ;;  %s2349_s25 = scalar_lea.vmem %s2348_s17, 256 }
  0x6e   : > { %p2350_p11 = scmp.lt.s32.totalorder %s491_s14, %s2348_s17  ;;  %p2351_p2 = scmp.lt.s32.totalorder %s2349_s25, %s2342_s27 }
  0x6f   : > { %p2346_p1 = pneg %p2345_p0 }
  0x70   : > { %p2352_p3 = por %p2351_p2, %p2350_p11 }
  0x72   : > { %p2353_p6 = pnand %p2352_p3, %p2346_p1 }
  0x74   : > { %2356 = shalt.err (!%p2353_p6)
}
  0x75   : > { %2023 = dma.hbm_to_vmem [thread:$0]  (!%p2680_p5), %s489_s12, 128, %s491_s14, %s480_s3, %s2484_s8, %s2484_s8, %s2485_s4  }
  0x76   : > { %s525_s11 = scalar_lea.vmem [#allocation11], %s2678_s24  ;;  %p2978_p13 = pmov %p2977_p10 }
  0x77   : > { %s534_s28 = sshll.u32 %s525_s11, 4  ;;  %s2489_s26 = smov [#allocation11]   ;;  %s535_s28 = int_to_ptr.vmem [resolvable:$true] %s534_s28 }
  0x78   : > { %s2370_s18 = scalar_lea.vmem %s535_s28, 128  ;;  %s2375_s13 = sshll.u32 %s2489_s26, 4  ;;  %s2376_s13 = int_to_ptr.vmem [resolvable:$false] %s2375_s13 }
  0x79   : > { %p2371_p7 = scmp.ne.s32.totalorder %s535_s28, %s2370_s18  ;;  %s2377_s27 = scalar_lea.vmem %s2376_s13, 256 }
  0x7a   : > { %p2378_p0 = scmp.lt.s32.totalorder %s535_s28, %s2376_s13  ;;  %p2379_p1 = scmp.lt.s32.totalorder %s2377_s27, %s2370_s18 }
  0x7b   : > { %p2373_p12 = pnand %p2371_p7, %p2978_p13 }
  0x7c   : > { %p2380_p11 = por %p2379_p1, %p2378_p0 }
  0x7d   : > { %p2374_p10 = pneg %p2373_p12 }
  0x7f   : > { %p2381_p2 = pnand %p2380_p11, %p2374_p10 }
  0x81   : > { %2384 = shalt.err (!%p2381_p2)
}
  0x82   : > { %2029 = dma.hbm_to_vmem [thread:$0]  (!%p2680_p5), %s533_s6, 128, %s535_s28, %s2690_s29, %s2484_s8, %s2484_s8, %s2485_s4  }
  0x83   : > { %552 = sbr.rel (%p2622_p8) target bundleno = 2060 (0x80c), region = 76  ;;  %s2762_s12 = sand.u32 (!%p2622_p8), 1, %s2461_s30  }
  0x84   : > { %s2765_s20 = sshll.u32 (!%p2622_p8), %s2762_s12, 3  ;;  %s555_s14 = scalar_lea.sflag (!%p2622_p8), [#allocation7], %s2762_s12 }
  0x85   : > { %s558_s1 = scalar_lea.vmem (!%p2622_p8), [#allocation6], %s2765_s20 }
  0x88   : > { %2436 = dma.done.wait (%p2612_p4), %s555_s14, 128  }
  0x89   : > { %2438 = vsyncadd (%p2612_p4), %s555_s14, 4294967168  ;;  %s563_s6 = sand.u32 1, %s2603_s19   ;;  %s567_s22 = scalar_lea.vmem [#allocation9], %s2765_s20 }
  0x8a   : > { %s564_s23 = scalar_lea.sflag [#allocation10], %s563_s6 }
  0x8b   : > { %2440 = dma.done.wait (%p2612_p4), %s564_s23, 256  }
  0x8c   : > { %2442 = vsyncadd (%p2612_p4), %s564_s23, 4294967040  ;;  %s576_s29 = scalar_lea.vmem [#allocation11], %s2765_s20  ;;  %p2979_p8 = scmp.eq.s32.totalorder %s2603_s19, 0 }
  0x8e   : > { %2444 = dma.done.wait (%p2979_p8), [#allocation13], 3072   ;;  %p2980_p5 = pmov %p2979_p8 }
  0x90   : > { %2446 = vsyncadd (%p2980_p5), [#allocation13], 4294964224  ;;  %p2981_p3 = pmov %p2980_p5 }
  0x92   : > { %2448 = dma.done.wait (%p2981_p3), [#allocation16], 3072   ;;  %p2982_p6 = pmov %p2981_p3 }
  0x93   : > { %v2490_v0 = vmov 0   ;;  %v2106_v1 = vld [vmem:[#allocation12 + $0x74] ss:$8 sps:$4 sm:$0xff]   ;;  %v2108_v2 = vld [vmem:[#allocation12 + $0x70] ss:$8 sps:$4 sm:$0xff]   ;;  %v2491_v27 = vmov 0.0   ;;  %v680_v45 = vlaneseq }
  0x94   : > { %2450 = vsyncadd (%p2982_p6), [#allocation16], 4294964224  ;;  %808 = vmatprep.mubr.bf16.mxu0 %v2490_v0  ;;  %987 = vmatprep.mubr.bf16.mxu1 %v2490_v0  ;;  %v2109_v3 = vld [vmem:[#allocation12 + $0x64] ss:$8 sps:$4 sm:$0xff]   ;;  %v2111_v4 = vld [vmem:[#allocation12 + $0x60] ss:$8 sps:$4 sm:$0xff]  }
  0x95   : > { %776 = vmatprep.subr.bf16.mxu0 %v2106_v1  ;;  %v2112_v5 = vld [vmem:[#allocation12 + $0x54] ss:$8 sps:$4 sm:$0xff]   ;;  %v2114_v6 = vld [vmem:[#allocation12 + $0x50] ss:$8 sps:$4 sm:$0xff]   ;;  %v2115_v7 = vld [vmem:[#allocation12 + $0x44] ss:$8 sps:$4 sm:$0xff]  }
  0x96   : > { %777 = vmatpush1.bf16.msra.mxu0 %v2108_v2  ;;  %v2117_v8 = vld [vmem:[#allocation12 + $0x40] ss:$8 sps:$4 sm:$0xff]   ;;  %v2118_v9 = vld [vmem:[#allocation12 + $0x34] ss:$8 sps:$4 sm:$0xff]   ;;  %v2120_v10 = vld [vmem:[#allocation12 + $0x30] ss:$8 sps:$4 sm:$0xff]  }
  0x97   : > { %778 = vmatprep.subr.bf16.mxu0 %v2109_v3  ;;  %v2121_v11 = vld [vmem:[#allocation12 + $0x24] ss:$8 sps:$4 sm:$0xff]   ;;  %v2123_v12 = vld [vmem:[#allocation12 + $0x20] ss:$8 sps:$4 sm:$0xff]   ;;  %v2124_v13 = vld [vmem:[#allocation12 + $0x14] ss:$8 sps:$4 sm:$0xff]  }
  0x98   : > { %v2140_v14 = vld [vmem:[#allocation15 + $0x74] ss:$8 sps:$4 sm:$0xff]   ;;  %v2142_v15 = vld [vmem:[#allocation15 + $0x70] ss:$8 sps:$4 sm:$0xff]   ;;  %v2143_v16 = vld [vmem:[#allocation15 + $0x64] ss:$8 sps:$4 sm:$0xff]  }
  0x99   : > { %v2126_v17 = vld [vmem:[#allocation12 + $0x10] ss:$8 sps:$4 sm:$0xff]   ;;  %955 = vmatprep.subr.bf16.mxu1 %v2140_v14  ;;  %v2127_v18 = vld [vmem:[#allocation12 + $0x4] ss:$8 sps:$4 sm:$0xff]   ;;  %v2145_v19 = vld [vmem:[#allocation15 + $0x60] ss:$8 sps:$4 sm:$0xff]  }
  0x9a   : > { %779 = vmatpush1.bf16.msra.mxu0 %v2111_v4  ;;  %956 = vmatpush1.bf16.msra.mxu1 %v2142_v15  ;;  %v2129_v20 = vld [vmem:[#allocation12] ss:$8 sps:$4 sm:$0xff]   ;;  %v2146_v21 = vld [vmem:[#allocation15 + $0x54] ss:$8 sps:$4 sm:$0xff]   ;;  %v2148_v22 = vld [vmem:[#allocation15 + $0x50] ss:$8 sps:$4 sm:$0xff]  }
  0x9b   : > { %780 = vmatprep.subr.bf16.mxu0 %v2112_v5  ;;  %957 = vmatprep.subr.bf16.mxu1 %v2143_v16  ;;  %v2149_v23 = vld [vmem:[#allocation15 + $0x44] ss:$8 sps:$4 sm:$0xff]   ;;  %v2130_v24 = vld [vmem:[%s558_s1] sm:$0xff]   ;;  %v2151_v26 = vld [vmem:[#allocation15 + $0x40] ss:$8 sps:$4 sm:$0xff]   ;;  %vm2492_vm0 = vmmov 0  }
  0x9c   : > { %v2131_v25 = vld [vmem:[#allocation14 + $0x38] sm:$0xff]   ;;  %v2132_v28 = vld [vmem:[#allocation14 + $0x30] sm:$0xff]   ;;  %v2133_v29 = vld [vmem:[#allocation14 + $0x28] sm:$0xff]   ;;  %v681_v46 = vshrl.u32 %v680_v45, 7  ;;  %p651_p4 = scmp.lt.s32.totalorder %s2469_s16, 1  ;;  %s2983_s26 = sld [smem:[#allocation32_spill]] }
  0x9d   : > { %v2134_v30 = vld [vmem:[#allocation14 + $0x20] sm:$0xff]   ;;  %v2135_v31 = vld [vmem:[#allocation14 + $0x18] sm:$0xff]   ;;  %v2136_v32 = vld [vmem:[#allocation14 + $0x10] sm:$0xff]   ;;  %vm1199_vm2 = vcmask 130048   ;;  %s2984_s24 = sld [smem:[#allocation36_spill]]  ;;  %s1786_s6 = sshll.u32 %s2762_s12, 4 }
  0x9e   : > { %781 = vmatpush1.bf16.msra.mxu0 %v2114_v6  ;;  %958 = vmatpush1.bf16.msra.mxu1 %v2145_v19  ;;  %v2137_v33 = vld [vmem:[#allocation14 + $0x8] sm:$0xff]   ;;  %v2138_v34 = vld [vmem:[#allocation14] sm:$0xff]   ;;  %v2139_v35 = vld [vmem:[%s576_s29] sm:$0xff]   ;;  %v682_v47 = vsub.s32 0, %v681_v46  ;;  %v686_v49 = vsub.s32 1, %v681_v46  ;;  %s652_s11 = scalar_select %p651_p4, %s2469_s16, 1 }
  0x9f   : > { %782 = vmatprep.subr.bf16.mxu0 %v2115_v7  ;;  %959 = vmatprep.subr.bf16.mxu1 %v2146_v21  ;;  %v2152_v36 = vld [vmem:[#allocation15 + $0x34] ss:$8 sps:$4 sm:$0xff]   ;;  %v2154_v37 = vld [vmem:[#allocation15 + $0x30] ss:$8 sps:$4 sm:$0xff]   ;;  %v2155_v38 = vld [vmem:[#allocation15 + $0x24] ss:$8 sps:$4 sm:$0xff]  }
  0xa0   : > { %v2157_v39 = vld [vmem:[#allocation15 + $0x20] ss:$8 sps:$4 sm:$0xff]   ;;  %v2158_v40 = vld [vmem:[#allocation15 + $0x14] ss:$8 sps:$4 sm:$0xff]   ;;  %v2160_v41 = vld [vmem:[#allocation15 + $0x10] ss:$8 sps:$4 sm:$0xff]  }
  0xa1   : > { %v2161_v42 = vld [vmem:[#allocation15 + $0x4] ss:$8 sps:$4 sm:$0xff]   ;;  %v2163_v43 = vld [vmem:[#allocation15] ss:$8 sps:$4 sm:$0xff]   ;;  %v678_v48 = vld [vmem:[%s2927_s5] sm:$0x3] }
  0xa2   : > { %783 = vmatpush1.bf16.msra.mxu0 %v2117_v8  ;;  %960 = vmatpush1.bf16.msra.mxu1 %v2148_v22  ;;  %v2164_v44 = vld [vmem:[%s567_s22] sm:$0xff]   ;;  %v683_v51 = vrot.slane %v678_v48, %v682_v47  ;;  %v687_v53 = vrot.slane %v678_v48, %v686_v49  ;;  %v1829_v63 = vld [vmem:[%s2929_s7] ss:$0 sm:$0xff]  ;;  %s653_s13 = scalar_lea.vmem %s2983_s26, %s652_s11  ;;  %s2985_s1 = sld [smem:[#allocation37_spill]] }
  0xa3   : > { %784 = vmatprep.subr.bf16.mxu0 %v2118_v9  ;;  %961 = vmatprep.subr.bf16.mxu1 %v2149_v23  ;;  %s2986_s29 = sld [smem:[#allocation38_spill]]  ;;  %s1872_s21 = sshll.u32 %s2469_s16, 8 }
  0xa4   : > { %s649_s8 = scalar_lea.vmem [#allocation18], %s1786_s6  ;;  %s2988_s11 = sld [smem:[#allocation39_spill]] }
  0xa5   : > { %s1584_s4 = sshll.u32 %s649_s8, 4  ;;  %s1569_s18 = scalar_lea.sflag [#allocation8], %s2762_s12  ;;  %s2874_s4 = int_to_ptr.vmem [resolvable:$true] %s1584_s4 }
  0xa6   : > { %785 = vmatpush1.bf16.msra.mxu0 %v2120_v10  ;;  %962 = vmatpush1.bf16.msra.mxu1 %v2151_v26  ;;  %v857_v10 = vld [vmem:[%s2931_s9] sm:$0x3]  ;;  %s2385_s26 = scalar_lea.vmem %s2874_s4, 256  ;;  %s2494_s16 = smov [#allocation18]  }
  0xa7   : > { %786 = vmatprep.subr.bf16.mxu0 %v2121_v11  ;;  %963 = vmatprep.subr.bf16.mxu1 %v2152_v36  ;;  %v862_v11 = vrot.slane %v857_v10, %v682_v47  ;;  %p2386_p7 = scmp.ne.s32.totalorder %s2874_s4, %s2385_s26 }
  0xa9   : > { %p2387_p13 = pnand %p2386_p7, %p2662_p9 }
  0xaa   : > { %787 = vmatpush1.bf16.msra.mxu0 %v2123_v12  ;;  %964 = vmatpush1.bf16.msra.mxu1 %v2154_v37  ;;  %s2872_s28 = scalar_lea.hbm %s2988_s11, %s1872_s21 }
  0xab   : > { %788 = vmatprep.subr.bf16.mxu0 %v2124_v13  ;;  %965 = vmatprep.subr.bf16.mxu1 %v2155_v38  ;;  %v866_v13 = vrot.slane %v857_v10, %v686_v49  ;;  %v2168_v49 = vld [vmem:[#allocation17 + $0x38] sm:$0xff]   ;;  %p2388_p12 = pneg %p2387_p13 }
  0xae   : > { %789 = vmatpush1.bf16.msra.mxu0 %v2126_v17  ;;  %966 = vmatpush1.bf16.msra.mxu1 %v2157_v39 }
  0xaf   : > { %790 = vmatprep.subr.bf16.mxu0 %v2127_v18  ;;  %967 = vmatprep.subr.bf16.mxu1 %v2158_v40 }
  0xb2   : > { %791 = vmatpush1.bf16.msra.mxu0 %v2129_v20  ;;  %968 = vmatpush1.bf16.msra.mxu1 %v2160_v41 }
  0xb3   : > { %1919 = vmatprep.subr.bf16.mxu0 %v2491_v27  ;;  %969 = vmatprep.subr.bf16.mxu1 %v2161_v42 }
  0xb5   : > { %809 = vmatmul.mubr.bf16.vlgmr.msra.gmra.mxu0 %v2130_v24  ;;  %v1018_v24 = vld [vmem:[%s653_s13] sm:$0x1]  ;;  %s2389_s13 = sshll.u32 %s2494_s16, 4  ;;  %s2390_s13 = int_to_ptr.vmem [resolvable:$false] %s2389_s13 }
  0xb6   : > { %1920 = vmatpush3.bf16.msra.mxu0 %v2131_v25  ;;  %1935 = vmatprep.mubr.msk.bf16.mxu0 %vm2492_vm0, %v2491_v27  ;;  %vm1019_vm1 = vcmp.gt.f32.partialorder %v1018_v24, 0.0  ;;  %v2493_v25 = vmov -1e+30   ;;  %s2391_s27 = scalar_lea.vmem %s2390_s13, 512  ;;  %p2392_p10 = scmp.lt.s32.totalorder %s2874_s4, %s2390_s13 }
  0xb7   : > { %1921 = vmatprep.subr.bf16.mxu0 %v2491_v27  ;;  %970 = vmatpush1.bf16.msra.mxu1 %v2163_v43  ;;  %v1020_v26 = vsel %vm1019_vm1, 0.0, %v2493_v25  ;;  %p2393_p0 = scmp.lt.s32.totalorder %s2391_s27, %s2385_s26 }
  0xb8   : > { %1939 = vmatprep.subr.bf16.mxu1 %v2491_v27 }
  0xb9   : > { %p2394_p1 = por %p2393_p0, %p2392_p10 }
  0xba   : > { %1922 = vmatpush3.bf16.msra.mxu0 %v2132_v28  ;;  %988 = vmatmul.mubr.bf16.vlgmr.msra.gmra.mxu1 %v2164_v44  ;;  %v2830_v28 = vrot.slane %v1020_v26, %v682_v47 }
  0xbb   : > { %1923 = vmatprep.subr.bf16.mxu0 %v2491_v27  ;;  %1941 = vmatprep.mubr.msk.bf16.mxu1 %vm2492_vm0, %v2491_v27  ;;  %p2395_p11 = pnand %p2394_p1, %p2388_p12 }
  0xbe   : > { %1924 = vmatpush3.bf16.msra.mxu0 %v2133_v29 }
  0xbf   : > { %1925 = vmatprep.subr.bf16.mxu0 %v2491_v27 }
  0xc2   : > { %1926 = vmatpush3.bf16.msra.mxu0 %v2134_v30 }
  0xc3   : > { %1927 = vmatprep.subr.bf16.mxu0 %v2491_v27 }
  0xc6   : > { %1928 = vmatpush3.bf16.msra.mxu0 %v2135_v31 }
  0xc7   : > { %1929 = vmatprep.subr.bf16.mxu0 %v2491_v27 }
  0xca   : > { %1930 = vmatpush3.bf16.msra.mxu0 %v2136_v32 }
  0xcb   : > { %1931 = vmatprep.subr.bf16.mxu0 %v2491_v27 }
  0xce   : > { %1932 = vmatpush3.bf16.msra.mxu0 %v2137_v33 }
  0xcf   : > { %1933 = vmatprep.subr.bf16.mxu0 %v2491_v27 }
  0xd2   : > { %1934 = vmatpush3.bf16.msra.mxu0 %v2138_v34 }
  0xd3   : > { %1971 = vmatprep.subr.bf16.mxu0 %v2491_v27 }
  0xd5   : > { %1936 = vmatmul.mubr.bf16.vlgmr.msra.gmra.mxu0 %v2139_v35 }
  0xd6   : > { %1973 = vmatprep.mubr.msk.bf16.mxu0 %vm2492_vm0, %v2491_v27 }
 0x175   : > { %v810_v50 = vpop.f32.mrf.mxu0 }
 0x176   : > { %v811_v55 = vadd.f32 %v810_v50, %v683_v51  ;;  %v2169_v50 = vld [vmem:[#allocation17 + $0x30] sm:$0xff]  }
 0x177   : > { %v812_v52 = vpop.f32.mrf.mxu0 }
 0x178   : > { %v813_v58 = vadd.f32 %v812_v52, %v687_v53  ;;  %v2171_v52 = vld [vmem:[#allocation17 + $0x20] sm:$0xff]  }
 0x179   : > { %v814_v54 = vpop.f32.mrf.mxu0 }
 0x17a   : > { %v815_v56 = vadd.f32 %v814_v54, %v683_v51  ;;  %v989_v12 = vpop.f32.mrf.mxu1  ;;  %v2170_v51 = vld [vmem:[#allocation17 + $0x28] sm:$0xff]   ;;  %v2173_v54 = vld [vmem:[#allocation17 + $0x10] sm:$0xff]  }
 0x17b   : > { %v816_v57 = vpop.f32.mrf.mxu0  ;;  %v990_v15 = vadd.f32 %v989_v12, %v862_v11 }
 0x17c   : > { %v1876_v59 = vpack.c.bf16 %v815_v56, %v811_v55  ;;  %v817_v60 = vadd.f32 %v816_v57, %v687_v53  ;;  %v991_v14 = vpop.f32.mrf.mxu1  ;;  %v2172_v53 = vld [vmem:[#allocation17 + $0x18] sm:$0xff]   ;;  %v2174_v55 = vld [vmem:[#allocation17 + $0x8] sm:$0xff]   ;;  %v2175_v56 = vld [vmem:[#allocation17] sm:$0xff]  }
 0x17d   : > { %v992_v17 = vadd.f32 %v991_v14, %v866_v13 }
 0x17e   : > { %1877 = vst [vmem:[#allocation2] sm:$0xff] %v1876_v59   ;;  %v1881_v61 = vpack.c.bf16 %v817_v60, %v813_v58  ;;  %v993_v16 = vpop.f32.mrf.mxu1 }
 0x17f   : > { %v994_v18 = vadd.f32 %v993_v16, %v862_v11 }
 0x180   : > { %1882 = vst [vmem:[#allocation3] sm:$0xff] %v1881_v61   ;;  %v995_v19 = vpop.f32.mrf.mxu1 }
 0x181   : > { %v1886_v20 = vpack.c.bf16 %v994_v18, %v990_v15  ;;  %v996_v21 = vadd.f32 %v995_v19, %v866_v13 }
 0x183   : > { %1887 = vst [vmem:[#allocation4] sm:$0xff] %v1886_v20   ;;  %v1891_v22 = vpack.c.bf16 %v996_v21, %v992_v17 }
 0x185   : > { %v2165_v62 = vld [vmem:[#allocation2] sm:$0xff]   ;;  %1892 = vst [vmem:[#allocation5] sm:$0xff] %v1891_v22  }
 0x186   : > { %1940 = vmatpush3.bf16.xpose.msra.mxu1 %v2165_v62 }
 0x187   : > { %1945 = vmatprep.subr.bf16.mxu1 %v2491_v27  ;;  %v2166_v9 = vld [vmem:[#allocation3] sm:$0xff]  }
 0x18a   : > { %v2167_v23 = vld [vmem:[#allocation4] sm:$0xff]  }
 0x18b   : > { %1972 = vmatpush3.bf16.xpose.msra.mxu0 %v2167_v23 }
 0x18c   : > { %1977 = vmatprep.subr.bf16.mxu0 %v2491_v27  ;;  %v2176_v16 = vld [vmem:[#allocation5] sm:$0xff]  }
 0x195   : > { %v1134_v0 = vpop.f32.mrf.mxu0 }
 0x196   : > { %v1135_v2 = vadd.f32 %v1829_v63, %v1134_v0 }
 0x197   : > { %v1937_v1 = vpop.f32.mrf.mxu0 }
 0x198   : > { %v1141_v6 = vmul.f32 0.17677669, %v1135_v2 }
 0x199   : > { %v1137_v3 = vpop.f32.mrf.mxu0 }
 0x19a   : > { %v1138_v4 = vadd.f32 %v1829_v63, %v1137_v3 }
 0x19b   : > { %v1938_v5 = vpop.f32.mrf.mxu0 }
 0x19c   : > { %v1142_v7 = vmul.f32 0.17677669, %v1138_v4 }
 0x19e   : > { %v1143_v8 = vpack.c.bf16 %v1142_v7, %v1141_v6  ;;  %v1842_v6 = vld [vmem:[%s2984_s24] ss:$0 sm:$0xff] }
 0x1a0   : > { %1942 = vmatmul.mubr.bf16.vlgmr.msra.gmra.mxu1 %v1143_v8 }
 0x1a1   : > { %1946 = vmatpush3.bf16.msra.mxu1 %v2166_v9  ;;  %1947 = vmatprep.mubr.msk.bf16.mxu1 %vm2492_vm0, %v2491_v27 }
 0x1a2   : > { %1951 = vmatprep.subr.bf16.mxu1 %v2491_v27 }
 0x260   : > { %v1192_v29 = vpop.f32.mrf.mxu1 }
 0x261   : > { %v1193_v30 = vadd.f32 %v1192_v29, %v2830_v28 }
 0x262   : > { %v1943_v31 = vpop.f32.mrf.mxu1 }
 0x263   : > { %v1200_v32 = vsel %vm1199_vm2, %v1193_v30, -inf }
 0x264   : > { %1201 = vmax.xlane.f32.xlu0 %v1200_v32  ;;  %v1195_v33 = vpop.f32.mrf.mxu1 }
 0x265   : > { %v1196_v34 = vadd.f32 %v1195_v33, %v2830_v28 }
 0x266   : > { %v1944_v35 = vpop.f32.mrf.mxu1 }
 0x267   : > { %v1203_v36 = vsel %vm1199_vm2, %v1196_v34, -inf }
 0x268   : > { %1204 = vmax.xlane.f32.xlu0 %v1203_v36 }
 0x2ed   : > { %v1202_v37 = vpop.xlane.xlu0 %1201 }
 0x2ee   : > { %v1206_v38 = vsub.f32 %v1193_v30, %v1202_v37 }
 0x2f0   : > { %v1208_v39 = vmul.f32 1.442695, %v1206_v38 }
 0x2f1   : > { %v1205_v40 = vpop.xlane.xlu0 %1204 }
 0x2f2   : > { %2177 = vpow2.f32 %v1208_v39  ;;  %v1207_v41 = vsub.f32 %v1196_v34, %v1205_v40 }
 0x2f4   : > { %v1210_v42 = vmul.f32 1.442695, %v1207_v41 }
 0x2f6   : > { %2179 = vpow2.f32 %v1210_v42 }
 0x2ff   : > { %v2178_v43 = vpop.eup %2177 }
 0x300   : > { %v1212_v44 = vsel %vm1199_vm2, %v2178_v43, 0.0 }
 0x301   : > { %1213 = vadd.xlane.f32.xlu1 %v1212_v44 }
 0x303   : > { %v2180_v46 = vpop.eup %2179 }
 0x304   : > { %v1215_v47 = vsel %vm1199_vm2, %v2180_v46, 0.0  ;;  %v1218_v48 = vpack.c.bf16 %v2180_v46, %v2178_v43 }
 0x305   : > { %1216 = vadd.xlane.f32.xlu1 %v1215_v47 }
 0x306   : > { %1948 = vmatmul.mubr.msk.bf16.vlgmr.msra.gmra.mxu1 %vm1199_vm2, %v1218_v48 }
 0x307   : > { %1967 = vmatprep.mubr.msk.bf16.mxu1 %vm2492_vm0, %v2491_v27  ;;  %1952 = vmatpush3.bf16.msra.mxu1 %v2168_v49 }
 0x308   : > { %1953 = vmatprep.subr.bf16.mxu1 %v2491_v27 }
 0x30b   : > { %1954 = vmatpush3.bf16.msra.mxu1 %v2169_v50  ;;  %v1528_v50 = vand.u32 127, %v680_v45 }
 0x30c   : > { %1955 = vmatprep.subr.bf16.mxu1 %v2491_v27 }
 0x30d   : > { %vm1529_vm3 = vcmp.lt.s32.totalorder %v1528_v50, 32 }
 0x30f   : > { %1956 = vmatpush3.bf16.msra.mxu1 %v2170_v51 }
 0x310   : > { %1957 = vmatprep.subr.bf16.mxu1 %v2491_v27 }
 0x313   : > { %1958 = vmatpush3.bf16.msra.mxu1 %v2171_v52 }
 0x314   : > { %1959 = vmatprep.subr.bf16.mxu1 %v2491_v27 }
 0x317   : > { %1960 = vmatpush3.bf16.msra.mxu1 %v2172_v53 }
 0x318   : > { %1961 = vmatprep.subr.bf16.mxu1 %v2491_v27 }
 0x31b   : > { %1962 = vmatpush3.bf16.msra.mxu1 %v2173_v54 }
 0x31c   : > { %1963 = vmatprep.subr.bf16.mxu1 %v2491_v27 }
 0x31f   : > { %1964 = vmatpush3.bf16.msra.mxu1 %v2174_v55 }
 0x320   : > { %1965 = vmatprep.subr.bf16.mxu1 %v2491_v27 }
 0x323   : > { %1966 = vmatpush3.bf16.msra.mxu1 %v2175_v56 }
 0x38a   : > { %v1214_v57 = vpop.xlane.xlu1 %1213 }
 0x38b   : > { %2181 = vrcp.f32 %v1214_v57 }
 0x38e   : > { %v1217_v58 = vpop.xlane.xlu1 %1216 }
 0x38f   : > { %2183 = vrcp.f32 %v1217_v58 }
 0x398   : > { %v2182_v60 = vpop.eup %2181 }
 0x39c   : > { %v2184_v63 = vpop.eup %2183 }
 0x3c6   : > { %v1264_v59 = vpop.f32.mrf.mxu1 }
 0x3c7   : > { %v1273_v62 = vmul.f32 %v2182_v60, %v1264_v59 }
 0x3c8   : > { %v1949_v61 = vpop.f32.mrf.mxu1 }
 0x3c9   : > { %v1275_v3 = vmax.f32 %v1273_v62, 0.0 }
 0x3ca   : > { %v1267_v0 = vpop.f32.mrf.mxu1 }
 0x3cb   : > { %v1274_v1 = vmul.f32 %v2184_v63, %v1267_v0 }
 0x3cc   : > { %v1950_v2 = vpop.f32.mrf.mxu1 }
 0x3cd   : > { %v1276_v4 = vmax.f32 %v1274_v1, 0.0  ;;  %v1854_v2 = vld [vmem:[%s2985_s1] ss:$0 sm:$0xff] }
 0x3cf   : > { %v1277_v5 = vpack.c.bf16 %v1276_v4, %v1275_v3  ;;  %v1855_v4 = vld [vmem:[%s2986_s29] ss:$0 sm:$0xff] }
 0x3d1   : > { %1968 = vmatmul.mubr.bf16.vlgmr.msra.gmra.mxu1 %v1277_v5 }
 0x491   : > { %v1383_v7 = vpop.f32.mrf.mxu1 }
 0x492   : > { %v1384_v9 = vadd.f32 %v1842_v6, %v1383_v7 }
 0x493   : > { %v1969_v8 = vpop.f32.mrf.mxu1 }
 0x494   : > { %v1390_v13 = vmul.f32 0.17677669, %v1384_v9 }
 0x495   : > { %v1386_v10 = vpop.f32.mrf.mxu1 }
 0x496   : > { %v1387_v11 = vadd.f32 %v1842_v6, %v1386_v10 }
 0x497   : > { %v1970_v12 = vpop.f32.mrf.mxu1 }
 0x498   : > { %v1391_v14 = vmul.f32 0.17677669, %v1387_v11 }
 0x49a   : > { %v1392_v15 = vpack.c.bf16 %v1391_v14, %v1390_v13 }
 0x49c   : > { %1974 = vmatmul.mubr.bf16.vlgmr.msra.gmra.mxu0 %v1392_v15 }
 0x49d   : > { %1978 = vmatpush3.bf16.msra.mxu0 %v2176_v16  ;;  %1979 = vmatprep.mubr.msk.bf16.mxu0 %vm2492_vm0, %v2491_v27 }
 0x55c   : > { %v1435_v17 = vpop.f32.mrf.mxu0 }
 0x55d   : > { %v1436_v18 = vadd.f32 %v1435_v17, %v2830_v28 }
 0x55e   : > { %v1975_v19 = vpop.f32.mrf.mxu0 }
 0x55f   : > { %v1442_v20 = vsel %vm1199_vm2, %v1436_v18, -inf }
 0x560   : > { %1443 = vmax.xlane.f32.xlu0 %v1442_v20  ;;  %v1438_v21 = vpop.f32.mrf.mxu0 }
 0x561   : > { %v1439_v22 = vadd.f32 %v1438_v21, %v2830_v28 }
 0x562   : > { %v1976_v23 = vpop.f32.mrf.mxu0 }
 0x563   : > { %v1445_v24 = vsel %vm1199_vm2, %v1439_v22, -inf }
 0x564   : > { %1446 = vmax.xlane.f32.xlu1 %v1445_v24 }
 0x5e9   : > { %v1444_v25 = vpop.xlane.xlu0 %1443 }
 0x5ea   : > { %v1448_v26 = vsub.f32 %v1436_v18, %v1444_v25 }
 0x5ec   : > { %v1450_v29 = vmul.f32 1.442695, %v1448_v26 }
 0x5ed   : > { %v1447_v30 = vpop.xlane.xlu1 %1446 }
 0x5ee   : > { %2185 = vpow2.f32 %v1450_v29  ;;  %v1449_v27 = vsub.f32 %v1439_v22, %v1447_v30 }
 0x5f0   : > { %v1452_v31 = vmul.f32 1.442695, %v1449_v27 }
 0x5f2   : > { %2187 = vpow2.f32 %v1452_v31 }
 0x5fb   : > { %v2186_v32 = vpop.eup %2185 }
 0x5fc   : > { %v1454_v33 = vsel %vm1199_vm2, %v2186_v32, 0.0 }
 0x5fd   : > { %1455 = vadd.xlane.f32.xlu0 %v1454_v33 }
 0x5ff   : > { %v2188_v34 = vpop.eup %2187 }
 0x600   : > { %v1457_v35 = vsel %vm1199_vm2, %v2188_v34, 0.0  ;;  %v1460_v28 = vpack.c.bf16 %v2188_v34, %v2186_v32 }
 0x601   : > { %1458 = vadd.xlane.f32.xlu1 %v1457_v35 }
 0x602   : > { %1980 = vmatmul.mubr.msk.bf16.vlgmr.msra.gmra.mxu0 %vm1199_vm2, %v1460_v28 }
 0x686   : > { %v1456_v36 = vpop.xlane.xlu0 %1455 }
 0x687   : > { %2189 = vrcp.f32 %v1456_v36 }
 0x68a   : > { %v1459_v37 = vpop.xlane.xlu1 %1458 }
 0x68b   : > { %2191 = vrcp.f32 %v1459_v37 }
 0x694   : > { %v2190_v38 = vpop.eup %2189 }
 0x698   : > { %v2192_v43 = vpop.eup %2191 }
 0x6c2   : > { %v1506_v39 = vpop.f32.mrf.mxu0 }
 0x6c3   : > { %v1515_v40 = vmul.f32 %v2190_v38, %v1506_v39 }
 0x6c4   : > { %v1981_v41 = vpop.f32.mrf.mxu0 }
 0x6c5   : > { %v1517_v42 = vmax.f32 %v1515_v40, 0.0 }
 0x6c6   : > { %v1509_v44 = vpop.f32.mrf.mxu0 }
 0x6c7   : > { %v1516_v46 = vmul.f32 %v2192_v43, %v1509_v44  ;;  %1519 = vadd.xlane.f32.xlu0 %v1517_v42 }
 0x6c8   : > { %v1982_v47 = vpop.f32.mrf.mxu0 }
 0x6c9   : > { %v1518_v48 = vmax.f32 %v1516_v46, 0.0 }
 0x6cb   : > { %1521 = vadd.xlane.f32.xlu1 %v1518_v48 }
 0x750   : > { %v1520_v49 = vpop.xlane.xlu0 %1519 }
 0x751   : > { %v1523_v51 = vmul.f32 0.03125, %v1520_v49 }
 0x753   : > { %v1525_v52 = vsub.f32 %v1517_v42, %v1523_v51 }
 0x754   : > { %v1522_v53 = vpop.xlane.xlu1 %1521 }
 0x755   : > { %v1524_v54 = vmul.f32 0.03125, %v1522_v53  ;;  %v1530_v55 = vmul.f32 %v1525_v52, %v1525_v52 }
 0x757   : > { %v1526_v56 = vsub.f32 %v1518_v48, %v1524_v54  ;;  %v1534_v57 = vsel %vm1529_vm3, %v1530_v55, 0.0 }
 0x758   : > { %1536 = vadd.xlane.f32.xlu0 %v1534_v57 }
 0x759   : > { %v1531_v58 = vmul.f32 %v1526_v56, %v1526_v56 }
 0x75b   : > { %v1535_v59 = vsel %vm1529_vm3, %v1531_v58, 0.0 }
 0x75c   : > { %1538 = vadd.xlane.f32.xlu1 %v1535_v59 }
 0x7e1   : > { %v1537_v60 = vpop.xlane.xlu0 %1536 }
 0x7e2   : > { %v1540_v61 = vmul.f32 0.03125, %v1537_v60 }
 0x7e4   : > { %v1542_v62 = vadd.f32 1e-05, %v1540_v61 }
 0x7e5   : > { %v1539_v63 = vpop.xlane.xlu1 %1538 }
 0x7e6   : > { %2193 = vrsqrt.f32 %v1542_v62  ;;  %v1541_v45 = vmul.f32 0.03125, %v1539_v63 }
 0x7e8   : > { %v1543_v0 = vadd.f32 1e-05, %v1541_v45 }
 0x7ea   : > { %2195 = vrsqrt.f32 %v1543_v0 }
 0x7f3   : > { %v2194_v1 = vpop.eup %2193 }
 0x7f4   : > { %v1546_v3 = vmul.f32 %v2194_v1, %v1525_v52 }
 0x7f6   : > { %v1555_v5 = vmul.f32 %v1854_v2, %v1546_v3 }
 0x7f7   : > { %v2196_v6 = vpop.eup %2195 }
 0x7f8   : > { %v1564_v7 = vadd.f32 %v1855_v4, %v1555_v5  ;;  %v1547_v8 = vmul.f32 %v2196_v6, %v1526_v56 }
 0x7fa   : > { %v1556_v9 = vmul.f32 %v1854_v2, %v1547_v8  ;;  %1566 = vst [vmem:[%s649_s8] sm:$0xff] %v1564_v7 }
 0x7fc   : > { %v1565_v10 = vadd.f32 %v1855_v4, %v1556_v9 }
 0x7fe   : > { %1567 = vst [vmem:[%s649_s8 + $0x8] sm:$0xff] %v1565_v10 }
 0x7ff   : > { %2398 = shalt.err (!%p2395_p11)
}
 0x800   : > { %s2399_s3 = scalar_lea.hbm %s2872_s28, 256  ;;  %s2403_s14 = scalar_lea.hbm %s2988_s11, 512 }
 0x801   : > { %p2400_p2 = scmp.ne.s32.totalorder %s2872_s28, %s2399_s3  ;;  %p2404_p3 = scmp.lt.s32.totalorder %s2872_s28, %s2988_s11 }
 0x802   : > { %p2405_p6 = scmp.lt.s32.totalorder %s2403_s14, %s2399_s3 }
 0x803   : > { %p2401_p8 = pnand %p2400_p2, %p2662_p9 }
 0x804   : > { %p2406_p4 = por %p2405_p6, %p2404_p3 }
 0x805   : > { %p2402_p5 = pneg %p2401_p8 }
 0x807   : > { %p2407_p7 = pnand %p2406_p4, %p2402_p5 }
 0x809   : > { %2410 = shalt.err (!%p2407_p7)
}
 0x80a   : > { %s2495_s23 = smov 128   ;;  %s2496_s22 = smov 8  }
 0x80b   : > { %2005 = dma.vmem_to_hbm [thread:$0]  (%p2662_p9), %s2874_s4, 256, %s2872_s28, %s1569_s18, %s2495_s23, %s2495_s23, %s2496_s22  }
 0x80c PF: > { %s2989_s29 = sld [smem:[#allocation24_spill]] }
 0x80d   : > { %s2990_s21 = sld [smem:[#allocation27_spill]] }
 0x80e   : > { %s2991_s8 = sld [smem:[#allocation26_spill]] }
 0x812   : > { %s1599_s17 = sand.u32 1, %s2989_s29  }
 0x813   : > { %p2992_p13 = scmp.ne.s32.totalorder %s2990_s21, 0  ;;  %s1600_s25 = scalar_lea.sflag [#allocation8], %s1599_s17 }
 0x814   : > { %p2993_p12 = scmp.ge.s32.totalorder %s2991_s8, 2 }
 0x816   : > { %p2031_p10 = pnand %p2993_p12, %p2992_p13 }
 0x818   : > { %p2032_p0 = pneg %p2031_p10 }
 0x81a   : > { %2452 = dma.done.wait (%p2032_p0), %s1600_s25, 256  }
 0x81b   : > { %2454 = vsyncadd (%p2032_p0), %s1600_s25, 4294967040  ;;  %s35_s18 = sadd.s32 1, %s2991_s8   ;;  %s2994_s19 = sld [smem:[#allocation30_spill]] }
 0x81c   : > { %p32_p1 = scmp.ge.s32.totalorder %s35_s18, 4   ;;  %s2995_s16 = sld [smem:[#allocation25_spill]] }
 0x81d   : > { %s2996_s17 = sld [smem:[#allocation28_spill]]  ;;  %s2997_s29 = smov %s2461_s30 }
 0x81e   : > { %s2998_s30 = smov %s2465_s15  ;;  %34 = sbr.rel (!%p32_p1) target bundleno = 20 (0x14), region = 168 }
 0x821   : > { %s2999_s15 = smov %s2994_s19 }
 0x823   :  { %1605 = vsyncpa [#allocation7], 1 }
 0x824   :  { %1607 = vsyncpa [#allocation7 + $0x1], 1 }
 0x825   :  { %1608 = vsyncpa [#allocation10], 1 }
 0x826   :  { %1610 = vsyncpa [#allocation10 + $0x1], 1 }
 0x827   :  { %1611 = vsyncpa [#allocation13], 1 }
 0x828   :  { %1612 = vsyncpa [#allocation16], 1 }
 0x829   :  { %1613 = vsyncpa [#allocation8], 1 }
 0x82a   :  { %1615 = vsyncpa [#allocation8 + $0x1], 1 }

</bundles_post_ra>
